<compile_context>
chip_gen: v6e
topology: v6e:2x2x1
jax: 0.10.0
libtpu: 0.0.40
codegen_flags: <defaults>
</compile_context>

<pallas_src>
import functools

import jax
import jax.numpy as jnp
from jax.experimental import pallas as pl
from jax.experimental.pallas import tpu as pltpu


# ----------------------------- helpers --------------------------------------

def _round_up(x, m):
    return ((x + m - 1) // m) * m


def _sigmoid(x):
    # sigmoid(x) == 0.5 * tanh(0.5 * x) + 0.5  -> single EUP op (vs exp + recip)
    return 0.5 * jnp.tanh(0.5 * x) + 0.5


# ----------------------------- fused Pallas kernel ---------------------------

def _fused_lstm_forward_kernel(x_ref, ew_ref, eb_ref, wcat_ref, bcat_ref,
                               h0_ref, c0_ref, ow_ref, ob_ref,
                               out_ref, h_out_ref, c_out_ref,
                               *, n_layers, hidden_pad):
    """Fused forward.

    Shapes (all lane/sublane padded, f32):
      x:    (Bp, Fin_p)
      ew:   (Fin_p, Hp)        eb: (1, Hp)
      wcat: (L, 2*Hp, 4*Hp)    bcat: (L, 1, 4*Hp)   (gate order [i, f, g, o],
                                each gate block Hp-wide -> lane aligned)
      h0/c0, h_out/c_out: (L, Bp, Hp)
      ow:   (Hp, Fout_p)       ob: (1, Fout_p)
      out:  (Bp, Fout_p)
    """
    H = hidden_pad

    # ---- embed: Linear(input, hidden) ----
    h_in = (jnp.dot(x_ref[...], ew_ref[...], preferred_element_type=jnp.float32)
            + eb_ref[...])

    # ---- stacked LSTM cells (statically unrolled; state stays in vregs/VMEM) ----
    for layer in range(n_layers):
        h_prev = h0_ref[layer]
        c_prev = c0_ref[layer]
        # one fused K = 2H matmul instead of two H-deep matmuls
        xh = jnp.concatenate([h_in, h_prev], axis=-1)          # (Bp, 2Hp)
        gates = (jnp.dot(xh, wcat_ref[layer],
                         preferred_element_type=jnp.float32)
                 + bcat_ref[layer])                             # (Bp, 4Hp)
        i_g = _sigmoid(gates[:, 0 * H:1 * H])
        f_g = _sigmoid(gates[:, 1 * H:2 * H])
        g_g = jnp.tanh(gates[:, 2 * H:3 * H])
        o_g = _sigmoid(gates[:, 3 * H:4 * H])
        c_new = f_g * c_prev + i_g * g_g
        h_new = o_g * jnp.tanh(c_new)
        h_out_ref[layer] = h_new.astype(h_out_ref.dtype)
        c_out_ref[layer] = c_new.astype(c_out_ref.dtype)
        h_in = h_new

    # ---- output: Linear(hidden, output) + Tanh (lane-dense, padded to 128) ----
    out = jnp.tanh(jnp.dot(h_in, ow_ref[...], preferred_element_type=jnp.float32)
                   + ob_ref[...])
    out_ref[...] = out.astype(out_ref.dtype)


# ----------------------------- parameter prep --------------------------------

def init_params(key, input_size, output_size, hidden_size, n_layers):
    """Deterministic parameter init (shapes match the torch module, weights
    stored pre-transposed as (in_features, out_features))."""
    def uniform(k, shape, scale):
        return jax.random.uniform(k, shape, jnp.float32, -scale, scale)

    keys = jax.random.split(key, 4 + 4 * n_layers)
    ki = iter(keys)
    params = {}
    s = 1.0 / jnp.sqrt(input_size)
    params["embed_w"] = uniform(next(ki), (input_size, hidden_size), s)
    params["embed_b"] = uniform(next(ki), (hidden_size,), s)
    s = 1.0 / jnp.sqrt(hidden_size)
    params["lstm"] = []
    for _ in range(n_layers):
        params["lstm"].append({
            "w_ih": uniform(next(ki), (hidden_size, 4 * hidden_size), s),
            "w_hh": uniform(next(ki), (hidden_size, 4 * hidden_size), s),
            "b_ih": uniform(next(ki), (4 * hidden_size,), s),
            "b_hh": uniform(next(ki), (4 * hidden_size,), s),
        })
    params["out_w"] = uniform(next(ki), (hidden_size, output_size), s)
    params["out_b"] = uniform(next(ki), (output_size,), s)
    return params


def prepare_fused_params(params, input_size, output_size, hidden_size, n_layers):
    """One-time padding/stacking of parameters into lane-aligned, fused layouts."""
    Fin_p = _round_up(input_size, 128)
    Hp = _round_up(hidden_size, 128)
    Fout_p = _round_up(output_size, 128)

    ew = jnp.zeros((Fin_p, Hp), jnp.float32)
    ew = ew.at[:input_size, :hidden_size].set(params["embed_w"])
    eb = jnp.zeros((1, Hp), jnp.float32).at[0, :hidden_size].set(params["embed_b"])

    # stacked [w_ih ; w_hh] per layer, each of the 4 gates padded to Hp lanes so
    # gate slices in the kernel fall exactly on 128-lane boundaries.
    wcat = jnp.zeros((n_layers, 2 * Hp, 4 * Hp), jnp.float32)
    bcat = jnp.zeros((n_layers, 1, 4 * Hp), jnp.float32)
    for l in range(n_layers):
        lp = params["lstm"][l]
        b_sum = lp["b_ih"] + lp["b_hh"]                        # combined once here
        for g in range(4):
            src = slice(g * hidden_size, (g + 1) * hidden_size)
            dst = slice(g * Hp, g * Hp + hidden_size)
            wcat = wcat.at[l, :hidden_size, dst].set(lp["w_ih"][:, src])
            wcat = wcat.at[l, Hp:Hp + hidden_size, dst].set(lp["w_hh"][:, src])
            bcat = bcat.at[l, 0, dst].set(b_sum[src])

    ow = jnp.zeros((Hp, Fout_p), jnp.float32)
    ow = ow.at[:hidden_size, :output_size].set(params["out_w"])
    ob = jnp.zeros((1, Fout_p), jnp.float32).at[0, :output_size].set(params["out_b"])

    return {
        "embed_w": ew, "embed_b": eb,
        "w_cat": wcat, "b_cat": bcat,
        "out_w": ow, "out_b": ob,
        "dims": (input_size, output_size, hidden_size, n_layers, Fin_p, Hp, Fout_p),
    }


# ----------------------------- forward (one pallas_call) ---------------------

def lstm_forward(fused, x, hidden):
    """Mirrors lstm.forward: returns (output, new_hidden).

    x: (batch, input_size); hidden: list of (h, c), each (batch, hidden_size).
    """
    (input_size, output_size, hidden_size, n_layers, Fin_p, Hp, Fout_p) = fused["dims"]
    x2 = x.reshape(-1, input_size)                              # input.view(-1, input_size)
    B = x2.shape[0]
    Bp = _round_up(B, 8)

    # pad activations / state to (sublane, lane) aligned shapes; padded hidden
    # columns stay exactly zero through the recurrence (zero weights/bias there).
    x_pad = jnp.zeros((Bp, Fin_p), jnp.float32).at[:B, :input_size].set(x2)
    h0 = jnp.zeros((n_layers, Bp, Hp), jnp.float32)
    c0 = jnp.zeros((n_layers, Bp, Hp), jnp.float32)
    for l in range(n_layers):
        h_l, c_l = hidden[l]
        h0 = h0.at[l, :B, :hidden_size].set(h_l)
        c0 = c0.at[l, :B, :hidden_size].set(c_l)

    kernel = functools.partial(_fused_lstm_forward_kernel,
                               n_layers=n_layers, hidden_pad=Hp)
    vmem = pl.BlockSpec(memory_space=pltpu.MemorySpace.VMEM)

    out_pad, h_out, c_out = pl.pallas_call(
        kernel,
        out_shape=(jax.ShapeDtypeStruct((Bp, Fout_p), jnp.float32),
                   jax.ShapeDtypeStruct((n_layers, Bp, Hp), jnp.float32),
                   jax.ShapeDtypeStruct((n_layers, Bp, Hp), jnp.float32)),
        in_specs=[vmem] * 9,
        out_specs=(vmem, vmem, vmem),
    )(x_pad, fused["embed_w"], fused["embed_b"], fused["w_cat"], fused["b_cat"],
      h0, c0, fused["out_w"], fused["out_b"])

    out = out_pad[:B, :output_size]
    new_hidden = [(h_out[l, :B, :hidden_size], c_out[l, :B, :hidden_size])
                  for l in range(n_layers)]
    return out, new_hidden


# ----------------------------- pure-JAX reference ----------------------------

def reference_forward(params, x, hidden, input_size, n_layers):
    x2 = x.reshape(-1, input_size)
    h_in = x2 @ params["embed_w"] + params["embed_b"]
    new_hidden = []
    for i in range(n_layers):
        h, c = hidden[i]
        lp = params["lstm"][i]
        gates = h_in @ lp["w_ih"] + h @ lp["w_hh"] + lp["b_ih"] + lp["b_hh"]
        H = h.shape[-1]
        i_g = jax.nn.sigmoid(gates[:, 0 * H:1 * H])
        f_g = jax.nn.sigmoid(gates[:, 1 * H:2 * H])
        g_g = jnp.tanh(gates[:, 2 * H:3 * H])
        o_g = jax.nn.sigmoid(gates[:, 3 * H:4 * H])
        c_new = f_g * c + i_g * g_g
        h_new = o_g * jnp.tanh(c_new)
        new_hidden.append((h_new, c_new))
        h_in = h_new
    out = jnp.tanh(h_in @ params["out_w"] + params["out_b"])
    return out, new_hidden


# ----------------------------- demo ------------------------------------------

if __name__ == "__main__":
    input_size = 16
    output_size = 8
    hidden_size = 32
    n_layers = 2
    batch_size = 2

    key = jax.random.PRNGKey(0)
    k_param, k_x, k_h = jax.random.split(key, 3)

    params = init_params(k_param, input_size, output_size, hidden_size, n_layers)
    fused = prepare_fused_params(params, input_size, output_size, hidden_size, n_layers)

    x = jax.random.normal(k_x, (batch_size, input_size), jnp.float32)
    h_keys = jax.random.split(k_h, 2 * n_layers)
    hidden = [
        (jax.random.normal(h_keys[2 * i], (batch_size, hidden_size), jnp.float32),
         jax.random.normal(h_keys[2 * i + 1], (batch_size, hidden_size), jnp.float32))
        for i in range(n_layers)
    ]

    out, new_hidden = lstm_forward(fused, x, hidden)
    jax.block_until_ready(out)
    for h, c in new_hidden:
        jax.block_until_ready(h)
        jax.block_until_ready(c)

    assert out.shape == (batch_size, output_size)
    assert all(h.shape == (batch_size, hidden_size) and c.shape == (batch_size, hidden_size)
               for h, c in new_hidden)

    # correctness vs pure-JAX reference
    ref_out, ref_hidden = reference_forward(params, x, hidden, input_size, n_layers)
    assert jnp.allclose(out, ref_out, rtol=2e-4, atol=2e-4)
    for (h, c), (rh, rc) in zip(new_hidden, ref_hidden):
        assert jnp.allclose(h, rh, rtol=2e-4, atol=2e-4)
        assert jnp.allclose(c, rc, rtol=2e-4, atol=2e-4)

    print("KERNEL_OK")
</pallas_src>

<mosaic_0001>
module attributes {stable_mosaic.version = 11 : i64} {
  func.func @_fused_lstm_forward_kernel(%arg0: memref<8x128xf32, #tpu.memory_space<vmem>>, %arg1: memref<128x128xf32, #tpu.memory_space<vmem>>, %arg2: memref<1x128xf32, #tpu.memory_space<vmem>>, %arg3: memref<2x256x512xf32, #tpu.memory_space<vmem>>, %arg4: memref<2x1x512xf32, #tpu.memory_space<vmem>>, %arg5: memref<2x8x128xf32, #tpu.memory_space<vmem>>, %arg6: memref<2x8x128xf32, #tpu.memory_space<vmem>>, %arg7: memref<128x128xf32, #tpu.memory_space<vmem>>, %arg8: memref<1x128xf32, #tpu.memory_space<vmem>>, %arg9: memref<8x128xf32, #tpu.memory_space<vmem>>, %arg10: memref<2x8x128xf32, #tpu.memory_space<vmem>>, %arg11: memref<2x8x128xf32, #tpu.memory_space<vmem>>) attributes {dimension_semantics = [], scalar_prefetch = 0 : i64, scratch_operands = 0 : i64, tpu.core_type = #tpu.core_type<tc>} {
    %c0 = arith.constant 0 : index
    %c0_0 = arith.constant 0 : index
    %0 = vector.load %arg0[%c0, %c0_0] : memref<8x128xf32, #tpu.memory_space<vmem>>, vector<8x128xf32>
    %c0_1 = arith.constant 0 : index
    %c0_2 = arith.constant 0 : index
    %1 = vector.load %arg1[%c0_1, %c0_2] : memref<128x128xf32, #tpu.memory_space<vmem>>, vector<128x128xf32>
    %cst = arith.constant dense<0.000000e+00> : vector<8x128xf32>
    %2 = tpu.matmul %0, %1, %cst {dimension_numbers = #tpu.dot_dimension_numbers<[1], [0], [0], [1], [0, 0, 1, 1], [], []>} : vector<8x128xf32>, vector<128x128xf32>, vector<8x128xf32> -> vector<8x128xf32>
    %c0_3 = arith.constant 0 : index
    %c0_4 = arith.constant 0 : index
    %3 = vector.load %arg2[%c0_3, %c0_4] : memref<1x128xf32, #tpu.memory_space<vmem>>, vector<1x128xf32>
    %4 = vector.broadcast %3 : vector<1x128xf32> to vector<8x128xf32>
    %5 = arith.addf %2, %4 : vector<8x128xf32>
    %c0_5 = arith.constant 0 : index
    %c0_6 = arith.constant 0 : index
    %c0_7 = arith.constant 0 : index
    %6 = vector.load %arg5[%c0_5, %c0_6, %c0_7] : memref<2x8x128xf32, #tpu.memory_space<vmem>>, vector<1x8x128xf32>
    %7 = vector.shape_cast %6 : vector<1x8x128xf32> to vector<8x128xf32>
    %c0_8 = arith.constant 0 : index
    %c0_9 = arith.constant 0 : index
    %c0_10 = arith.constant 0 : index
    %8 = vector.load %arg6[%c0_8, %c0_9, %c0_10] : memref<2x8x128xf32, #tpu.memory_space<vmem>>, vector<1x8x128xf32>
    %9 = vector.shape_cast %8 : vector<1x8x128xf32> to vector<8x128xf32>
    %10 = tpu.concatenate %5, %7 in 1 : vector<8x128xf32>, vector<8x128xf32> -> vector<8x256xf32>
    %c0_11 = arith.constant 0 : index
    %c0_12 = arith.constant 0 : index
    %c0_13 = arith.constant 0 : index
    %11 = vector.load %arg3[%c0_11, %c0_12, %c0_13] : memref<2x256x512xf32, #tpu.memory_space<vmem>>, vector<1x256x512xf32>
    %12 = vector.shape_cast %11 : vector<1x256x512xf32> to vector<256x512xf32>
    %cst_14 = arith.constant dense<0.000000e+00> : vector<8x512xf32>
    %13 = tpu.matmul %10, %12, %cst_14 {dimension_numbers = #tpu.dot_dimension_numbers<[1], [0], [0], [1], [0, 0, 1, 1], [], []>} : vector<8x256xf32>, vector<256x512xf32>, vector<8x512xf32> -> vector<8x512xf32>
    %c0_15 = arith.constant 0 : index
    %c0_16 = arith.constant 0 : index
    %c0_17 = arith.constant 0 : index
    %14 = vector.load %arg4[%c0_15, %c0_16, %c0_17] : memref<2x1x512xf32, #tpu.memory_space<vmem>>, vector<1x1x512xf32>
    %15 = vector.shape_cast %14 : vector<1x1x512xf32> to vector<1x512xf32>
    %16 = vector.broadcast %15 : vector<1x512xf32> to vector<8x512xf32>
    %17 = arith.addf %13, %16 : vector<8x512xf32>
    %18 = vector.extract_strided_slice %17 {offsets = [0, 0], sizes = [8, 128], strides = [1, 1]} : vector<8x512xf32> to vector<8x128xf32>
    %cst_18 = arith.constant 5.000000e-01 : f32
    %19 = vector.broadcast %cst_18 : f32 to vector<8x128xf32>
    %20 = arith.mulf %19, %18 : vector<8x128xf32>
    %21 = math.tanh %20 : vector<8x128xf32>
    %cst_19 = arith.constant 5.000000e-01 : f32
    %22 = vector.broadcast %cst_19 : f32 to vector<8x128xf32>
    %23 = arith.mulf %22, %21 : vector<8x128xf32>
    %cst_20 = arith.constant 5.000000e-01 : f32
    %24 = vector.broadcast %cst_20 : f32 to vector<8x128xf32>
    %25 = arith.addf %23, %24 : vector<8x128xf32>
    %26 = vector.extract_strided_slice %17 {offsets = [0, 128], sizes = [8, 128], strides = [1, 1]} : vector<8x512xf32> to vector<8x128xf32>
    %cst_21 = arith.constant 5.000000e-01 : f32
    %27 = vector.broadcast %cst_21 : f32 to vector<8x128xf32>
    %28 = arith.mulf %27, %26 : vector<8x128xf32>
    %29 = math.tanh %28 : vector<8x128xf32>
    %cst_22 = arith.constant 5.000000e-01 : f32
    %30 = vector.broadcast %cst_22 : f32 to vector<8x128xf32>
    %31 = arith.mulf %30, %29 : vector<8x128xf32>
    %cst_23 = arith.constant 5.000000e-01 : f32
    %32 = vector.broadcast %cst_23 : f32 to vector<8x128xf32>
    %33 = arith.addf %31, %32 : vector<8x128xf32>
    %34 = vector.extract_strided_slice %17 {offsets = [0, 256], sizes = [8, 128], strides = [1, 1]} : vector<8x512xf32> to vector<8x128xf32>
    %35 = math.tanh %34 : vector<8x128xf32>
    %36 = vector.extract_strided_slice %17 {offsets = [0, 384], sizes = [8, 128], strides = [1, 1]} : vector<8x512xf32> to vector<8x128xf32>
    %cst_24 = arith.constant 5.000000e-01 : f32
    %37 = vector.broadcast %cst_24 : f32 to vector<8x128xf32>
    %38 = arith.mulf %37, %36 : vector<8x128xf32>
    %39 = math.tanh %38 : vector<8x128xf32>
    %cst_25 = arith.constant 5.000000e-01 : f32
    %40 = vector.broadcast %cst_25 : f32 to vector<8x128xf32>
    %41 = arith.mulf %40, %39 : vector<8x128xf32>
    %cst_26 = arith.constant 5.000000e-01 : f32
    %42 = vector.broadcast %cst_26 : f32 to vector<8x128xf32>
    %43 = arith.addf %41, %42 : vector<8x128xf32>
    %44 = arith.mulf %33, %9 : vector<8x128xf32>
    %45 = arith.mulf %25, %35 : vector<8x128xf32>
    %46 = arith.addf %44, %45 : vector<8x128xf32>
    %47 = math.tanh %46 : vector<8x128xf32>
    %48 = arith.mulf %43, %47 : vector<8x128xf32>
    %c0_27 = arith.constant 0 : index
    %c0_28 = arith.constant 0 : index
    %c0_29 = arith.constant 0 : index
    %49 = vector.load %arg10[%c0_27, %c0_28, %c0_29] : memref<2x8x128xf32, #tpu.memory_space<vmem>>, vector<1x8x128xf32>
    %50 = vector.shape_cast %49 : vector<1x8x128xf32> to vector<8x128xf32>
    %51 = vector.shape_cast %48 : vector<8x128xf32> to vector<1x8x128xf32>
    tpu.vector_store %arg10[%c0_27, %c0_28, %c0_29], %51 {strides = array<i32>} : memref<2x8x128xf32, #tpu.memory_space<vmem>>, vector<1x8x128xf32>,
    %c0_30 = arith.constant 0 : index
    %c0_31 = arith.constant 0 : index
    %c0_32 = arith.constant 0 : index
    %52 = vector.load %arg11[%c0_30, %c0_31, %c0_32] : memref<2x8x128xf32, #tpu.memory_space<vmem>>, vector<1x8x128xf32>
    %53 = vector.shape_cast %52 : vector<1x8x128xf32> to vector<8x128xf32>
    %54 = vector.shape_cast %46 : vector<8x128xf32> to vector<1x8x128xf32>
    tpu.vector_store %arg11[%c0_30, %c0_31, %c0_32], %54 {strides = array<i32>} : memref<2x8x128xf32, #tpu.memory_space<vmem>>, vector<1x8x128xf32>,
    %c1 = arith.constant 1 : index
    %c0_33 = arith.constant 0 : index
    %c0_34 = arith.constant 0 : index
    %55 = vector.load %arg5[%c1, %c0_33, %c0_34] : memref<2x8x128xf32, #tpu.memory_space<vmem>>, vector<1x8x128xf32>
    %56 = vector.shape_cast %55 : vector<1x8x128xf32> to vector<8x128xf32>
    %c1_35 = arith.constant 1 : index
    %c0_36 = arith.constant 0 : index
    %c0_37 = arith.constant 0 : index
    %57 = vector.load %arg6[%c1_35, %c0_36, %c0_37] : memref<2x8x128xf32, #tpu.memory_space<vmem>>, vector<1x8x128xf32>
    %58 = vector.shape_cast %57 : vector<1x8x128xf32> to vector<8x128xf32>
    %59 = tpu.concatenate %48, %56 in 1 : vector<8x128xf32>, vector<8x128xf32> -> vector<8x256xf32>
    %c1_38 = arith.constant 1 : index
    %c0_39 = arith.constant 0 : index
    %c0_40 = arith.constant 0 : index
    %60 = vector.load %arg3[%c1_38, %c0_39, %c0_40] : memref<2x256x512xf32, #tpu.memory_space<vmem>>, vector<1x256x512xf32>
    %61 = vector.shape_cast %60 : vector<1x256x512xf32> to vector<256x512xf32>
    %cst_41 = arith.constant dense<0.000000e+00> : vector<8x512xf32>
    %62 = tpu.matmul %59, %61, %cst_41 {dimension_numbers = #tpu.dot_dimension_numbers<[1], [0], [0], [1], [0, 0, 1, 1], [], []>} : vector<8x256xf32>, vector<256x512xf32>, vector<8x512xf32> -> vector<8x512xf32>
    %c1_42 = arith.constant 1 : index
    %c0_43 = arith.constant 0 : index
    %c0_44 = arith.constant 0 : index
    %63 = vector.load %arg4[%c1_42, %c0_43, %c0_44] : memref<2x1x512xf32, #tpu.memory_space<vmem>>, vector<1x1x512xf32>
    %64 = vector.shape_cast %63 : vector<1x1x512xf32> to vector<1x512xf32>
    %65 = vector.broadcast %64 : vector<1x512xf32> to vector<8x512xf32>
    %66 = arith.addf %62, %65 : vector<8x512xf32>
    %67 = vector.extract_strided_slice %66 {offsets = [0, 0], sizes = [8, 128], strides = [1, 1]} : vector<8x512xf32> to vector<8x128xf32>
    %cst_45 = arith.constant 5.000000e-01 : f32
    %68 = vector.broadcast %cst_45 : f32 to vector<8x128xf32>
    %69 = arith.mulf %68, %67 : vector<8x128xf32>
    %70 = math.tanh %69 : vector<8x128xf32>
    %cst_46 = arith.constant 5.000000e-01 : f32
    %71 = vector.broadcast %cst_46 : f32 to vector<8x128xf32>
    %72 = arith.mulf %71, %70 : vector<8x128xf32>
    %cst_47 = arith.constant 5.000000e-01 : f32
    %73 = vector.broadcast %cst_47 : f32 to vector<8x128xf32>
    %74 = arith.addf %72, %73 : vector<8x128xf32>
    %75 = vector.extract_strided_slice %66 {offsets = [0, 128], sizes = [8, 128], strides = [1, 1]} : vector<8x512xf32> to vector<8x128xf32>
    %cst_48 = arith.constant 5.000000e-01 : f32
    %76 = vector.broadcast %cst_48 : f32 to vector<8x128xf32>
    %77 = arith.mulf %76, %75 : vector<8x128xf32>
    %78 = math.tanh %77 : vector<8x128xf32>
    %cst_49 = arith.constant 5.000000e-01 : f32
    %79 = vector.broadcast %cst_49 : f32 to vector<8x128xf32>
    %80 = arith.mulf %79, %78 : vector<8x128xf32>
    %cst_50 = arith.constant 5.000000e-01 : f32
    %81 = vector.broadcast %cst_50 : f32 to vector<8x128xf32>
    %82 = arith.addf %80, %81 : vector<8x128xf32>
    %83 = vector.extract_strided_slice %66 {offsets = [0, 256], sizes = [8, 128], strides = [1, 1]} : vector<8x512xf32> to vector<8x128xf32>
    %84 = math.tanh %83 : vector<8x128xf32>
    %85 = vector.extract_strided_slice %66 {offsets = [0, 384], sizes = [8, 128], strides = [1, 1]} : vector<8x512xf32> to vector<8x128xf32>
    %cst_51 = arith.constant 5.000000e-01 : f32
    %86 = vector.broadcast %cst_51 : f32 to vector<8x128xf32>
    %87 = arith.mulf %86, %85 : vector<8x128xf32>
    %88 = math.tanh %87 : vector<8x128xf32>
    %cst_52 = arith.constant 5.000000e-01 : f32
    %89 = vector.broadcast %cst_52 : f32 to vector<8x128xf32>
    %90 = arith.mulf %89, %88 : vector<8x128xf32>
    %cst_53 = arith.constant 5.000000e-01 : f32
    %91 = vector.broadcast %cst_53 : f32 to vector<8x128xf32>
    %92 = arith.addf %90, %91 : vector<8x128xf32>
    %93 = arith.mulf %82, %58 : vector<8x128xf32>
    %94 = arith.mulf %74, %84 : vector<8x128xf32>
    %95 = arith.addf %93, %94 : vector<8x128xf32>
    %96 = math.tanh %95 : vector<8x128xf32>
    %97 = arith.mulf %92, %96 : vector<8x128xf32>
    %c1_54 = arith.constant 1 : index
    %c0_55 = arith.constant 0 : index
    %c0_56 = arith.constant 0 : index
    %98 = vector.load %arg10[%c1_54, %c0_55, %c0_56] : memref<2x8x128xf32, #tpu.memory_space<vmem>>, vector<1x8x128xf32>
    %99 = vector.shape_cast %98 : vector<1x8x128xf32> to vector<8x128xf32>
    %100 = vector.shape_cast %97 : vector<8x128xf32> to vector<1x8x128xf32>
    tpu.vector_store %arg10[%c1_54, %c0_55, %c0_56], %100 {strides = array<i32>} : memref<2x8x128xf32, #tpu.memory_space<vmem>>, vector<1x8x128xf32>,
    %c1_57 = arith.constant 1 : index
    %c0_58 = arith.constant 0 : index
    %c0_59 = arith.constant 0 : index
    %101 = vector.load %arg11[%c1_57, %c0_58, %c0_59] : memref<2x8x128xf32, #tpu.memory_space<vmem>>, vector<1x8x128xf32>
    %102 = vector.shape_cast %101 : vector<1x8x128xf32> to vector<8x128xf32>
    %103 = vector.shape_cast %95 : vector<8x128xf32> to vector<1x8x128xf32>
    tpu.vector_store %arg11[%c1_57, %c0_58, %c0_59], %103 {strides = array<i32>} : memref<2x8x128xf32, #tpu.memory_space<vmem>>, vector<1x8x128xf32>,
    %c0_60 = arith.constant 0 : index
    %c0_61 = arith.constant 0 : index
    %104 = vector.load %arg7[%c0_60, %c0_61] : memref<128x128xf32, #tpu.memory_space<vmem>>, vector<128x128xf32>
    %cst_62 = arith.constant dense<0.000000e+00> : vector<8x128xf32>
    %105 = tpu.matmul %97, %104, %cst_62 {dimension_numbers = #tpu.dot_dimension_numbers<[1], [0], [0], [1], [0, 0, 1, 1], [], []>} : vector<8x128xf32>, vector<128x128xf32>, vector<8x128xf32> -> vector<8x128xf32>
    %c0_63 = arith.constant 0 : index
    %c0_64 = arith.constant 0 : index
    %106 = vector.load %arg8[%c0_63, %c0_64] : memref<1x128xf32, #tpu.memory_space<vmem>>, vector<1x128xf32>
    %107 = vector.broadcast %106 : vector<1x128xf32> to vector<8x128xf32>
    %108 = arith.addf %105, %107 : vector<8x128xf32>
    %109 = math.tanh %108 : vector<8x128xf32>
    %c0_65 = arith.constant 0 : index
    %c0_66 = arith.constant 0 : index
    %110 = vector.load %arg9[%c0_65, %c0_66] : memref<8x128xf32, #tpu.memory_space<vmem>>, vector<8x128xf32>
    tpu.vector_store %arg9[%c0_65, %c0_66], %109 {strides = array<i32>} : memref<8x128xf32, #tpu.memory_space<vmem>>, vector<8x128xf32>,
    return
  }
}

</mosaic_0001>

<bundles_post_ra>
// kernel: tpu_custom_call.1
= control target key start
LH: loop header
LB: loop body
LE: loop exit
PB: predicated region body
PF: predicated region fallthrough
CT: control target
= control target key end

     0   :  { %17 = vsyncpa [#allocation3], 0  ;;  %s1550_s0 = inlined_call_operand.hbm [shape: f32[8,128], index: 0, kind: input, shape index: {}]   ;;  %s1551_s1 = inlined_call_operand.hbm [shape: f32[128,128], index: 1, kind: input, shape index: {}]   ;;  %s1552_s2 = inlined_call_operand.vmem [shape: f32[1,128], index: 2, kind: input, shape index: {}]   ;;  %s1553_s3 = inlined_call_operand.hbm [shape: f32[2,256,512], index: 3, kind: input, shape index: {}]   ;;  %s1554_s4 = inlined_call_operand.hbm [shape: f32[2,1,512], index: 4, kind: input, shape index: {}]   ;;  %s1555_s5 = inlined_call_operand.hbm [shape: f32[2,8,128], index: 5, kind: input, shape index: {}]   ;;  %s1556_s6 = inlined_call_operand.hbm [shape: f32[2,8,128], index: 6, kind: input, shape index: {}]   ;;  %s1557_s7 = inlined_call_operand.hbm [shape: f32[128,128], index: 7, kind: input, shape index: {}]   ;;  %s1558_s8 = inlined_call_operand.vmem [shape: f32[1,128], index: 8, kind: input, shape index: {}]   ;;  %s1559_s9 = inlined_call_operand.hbm [shape: f32[8,128], index: 9, kind: output, shape index: {0}]   ;;  %s1560_s10 = inlined_call_operand.hbm [shape: f32[2,8,128], index: 10, kind: output, shape index: {1}]   ;;  %s1561_s11 = inlined_call_operand.hbm [shape: f32[2,8,128], index: 11, kind: output, shape index: {2}]  }
   0x1   :  { %18 = vsyncpa [#allocation6], 0 }
   0x2   :  { %19 = vsyncpa [#allocation9], 0 }
   0x3   :  { %20 = vsyncpa [#allocation12], 0 }
   0x4   :  { %21 = vsyncpa [#allocation4], 0 }
   0x5   :  { %22 = vsyncpa [#allocation16], 0  ;;  %s1360_s17 = smov [#allocation5]  }
   0x6   :  { %s38_s18 = sshll.u32 %s1360_s17, 4  ;;  %s39_s18 = int_to_ptr.vmem [resolvable:$true] %s38_s18 }
   0x7   :  { %s1156_s19 = scalar_lea.vmem %s39_s18, 2048  ;;  %p1161_p1 = scmp.lt.s32.totalorder %s39_s18, %s39_s18 }
   0x8   :  { %p1157_p0 = scmp.ne.s32.totalorder %s39_s18, %s1156_s19  ;;  %p1162_p2 = scmp.lt.s32.totalorder %s1156_s19, %s1156_s19 }
   0xa   :  { %p1163_p3 = por %p1162_p2, %p1161_p1 }
   0xc   :  { %p1164_p4 = pnand %p1163_p3, %p1157_p0 }
   0xe   :  { %1167 = shalt.err (!%p1164_p4)
}
   0xf   :  { %s1361_s20 = smov 128   ;;  %s1362_s21 = smov 8  }
  0x10   :  { %44 = dma.hbm_to_vmem [thread:$0]  %s1551_s1, 2048, %s39_s18, [#allocation6], %s1361_s20, %s1361_s20, %s1362_s21  }
  0x11   :  { %s1363_s24 = smov [#allocation8]  }
  0x12   :  { %s64_s25 = sshll.u32 %s1363_s24, 4  ;;  %s65_s25 = int_to_ptr.vmem [resolvable:$true] %s64_s25 }
  0x13   :  { %s1176_s26 = scalar_lea.vmem %s65_s25, 128  ;;  %p1181_p6 = scmp.lt.s32.totalorder %s65_s25, %s65_s25 }
  0x14   :  { %p1177_p5 = scmp.ne.s32.totalorder %s65_s25, %s1176_s26  ;;  %p1182_p7 = scmp.lt.s32.totalorder %s1176_s26, %s1176_s26 }
  0x16   :  { %p1183_p8 = por %p1182_p7, %p1181_p6 }
  0x18   :  { %p1184_p9 = pnand %p1183_p8, %p1177_p5 }
  0x1a   :  { %1187 = shalt.err (!%p1184_p9)
}
  0x1b   :  { %s1364_s27 = smov 64   ;;  %s1365_s28 = smov 4  }
  0x1c   :  { %70 = dma.hbm_to_vmem [thread:$0]  %s1554_s4, 128, %s65_s25, [#allocation9], %s1364_s27, %s1364_s27, %s1365_s28  }
  0x1d   :  { %s1366_s12 = smov [#allocation11]   ;;  %s1367_s14 = smov [#allocation2]  }
  0x1e   :  { %s88_s13 = sshll.u32 %s1366_s12, 4  ;;  %s29_s1 = sshll.u32 %s1367_s14, 4  ;;  %s89_s13 = int_to_ptr.vmem [resolvable:$true] %s88_s13  ;;  %s30_s1 = int_to_ptr.vmem [resolvable:$true] %s29_s1 }
  0x1f   :  { %s1196_s15 = scalar_lea.vmem %s89_s13, 256  ;;  %p1201_p11 = scmp.lt.s32.totalorder %s89_s13, %s89_s13 }
  0x20   :  { %p1197_p10 = scmp.ne.s32.totalorder %s89_s13, %s1196_s15  ;;  %p1202_p12 = scmp.lt.s32.totalorder %s1196_s15, %s1196_s15 }
  0x22   :  { %p1203_p13 = por %p1202_p12, %p1201_p11 }
  0x24   :  { %p1204_p0 = pnand %p1203_p13, %p1197_p10 }
  0x26   :  { %1207 = shalt.err (!%p1204_p0)
}
  0x27   :  { %94 = dma.hbm_to_vmem [thread:$0]  %s1556_s6, 256, %s89_s13, [#allocation12], %s1361_s20, %s1361_s20, %s1362_s21  }
  0x28   :  { %s1216_s4 = scalar_lea.vmem %s30_s1, 128  ;;  %p1221_p2 = scmp.lt.s32.totalorder %s30_s1, %s30_s1 }
  0x29   :  { %p1217_p1 = scmp.ne.s32.totalorder %s30_s1, %s1216_s4  ;;  %p1222_p3 = scmp.lt.s32.totalorder %s1216_s4, %s1216_s4 }
  0x2b   :  { %p1223_p4 = por %p1222_p3, %p1221_p2 }
  0x2d   :  { %p1224_p5 = pnand %p1223_p4, %p1217_p1 }
  0x2f   :  { %1227 = shalt.err (!%p1224_p5)
}
  0x30   :  { %32 = dma.hbm_to_vmem [thread:$0]  %s1550_s0, 128, %s30_s1, [#allocation3]  }
  0x31   :  { %s1368_s22 = smov [#allocation7]  }
  0x32   :  { %s52_s23 = sshll.u32 %s1368_s22, 4  ;;  %s53_s23 = int_to_ptr.vmem [resolvable:$true] %s52_s23 }
  0x33   :  { %s1236_s24 = scalar_lea.vmem %s53_s23, 32768  ;;  %p1241_p7 = scmp.lt.s32.totalorder %s53_s23, %s53_s23 }
  0x34   :  { %p1237_p6 = scmp.ne.s32.totalorder %s53_s23, %s1236_s24  ;;  %p1242_p8 = scmp.lt.s32.totalorder %s1236_s24, %s1236_s24 }
  0x36   :  { %p1243_p9 = por %p1242_p8, %p1241_p7 }
  0x38   :  { %p1244_p10 = pnand %p1243_p9, %p1237_p6 }
  0x3a   :  { %1247 = shalt.err (!%p1244_p10)
}
  0x3b   :  { %s1369_s6 = smov 512   ;;  %s1370_s25 = smov 32  }
  0x3c   :  { %58 = dma.hbm_to_vmem [thread:$0]  %s1553_s3, 32768, %s53_s23, [#allocation6], %s1369_s6, %s1369_s6, %s1370_s25  }
  0x3d   :  { %s1371_s28 = smov [#allocation10]   ;;  %s1372_s0 = smov [#allocation13]  }
  0x3e   :  { %s76_s29 = sshll.u32 %s1371_s28, 4  ;;  %s100_s30 = sshll.u32 %s1372_s0, 4  ;;  %s77_s29 = int_to_ptr.vmem [resolvable:$true] %s76_s29  ;;  %s101_s30 = int_to_ptr.vmem [resolvable:$true] %s100_s30 }
  0x3f   :  { %s1256_s12 = scalar_lea.vmem %s77_s29, 256  ;;  %p1261_p12 = scmp.lt.s32.totalorder %s77_s29, %s77_s29 }
  0x40   :  { %p1257_p11 = scmp.ne.s32.totalorder %s77_s29, %s1256_s12  ;;  %p1262_p13 = scmp.lt.s32.totalorder %s1256_s12, %s1256_s12 }
  0x42   :  { %p1263_p0 = por %p1262_p13, %p1261_p12 }
  0x44   :  { %p1264_p1 = pnand %p1263_p0, %p1257_p11 }
  0x46   :  { %1267 = shalt.err (!%p1264_p1)
}
  0x47   :  { %82 = dma.hbm_to_vmem [thread:$0]  %s1555_s5, 256, %s77_s29, [#allocation9], %s1361_s20, %s1361_s20, %s1362_s21  }
  0x48   :  { %s1276_s3 = scalar_lea.vmem %s101_s30, 2048  ;;  %p1281_p3 = scmp.lt.s32.totalorder %s101_s30, %s101_s30 }
  0x49   :  { %p1277_p2 = scmp.ne.s32.totalorder %s101_s30, %s1276_s3  ;;  %p1282_p4 = scmp.lt.s32.totalorder %s1276_s3, %s1276_s3 }
  0x4b   :  { %p1283_p5 = por %p1282_p4, %p1281_p3 }
  0x4d   :  { %p1284_p6 = pnand %p1283_p5, %p1277_p2 }
  0x4f   :  { %1287 = shalt.err (!%p1284_p6)
}
  0x50   :  { %106 = dma.hbm_to_vmem [thread:$0]  %s1557_s7, 2048, %s101_s30, [#allocation12], %s1361_s20, %s1361_s20, %s1362_s21  }
  0x51   :  { %1348 = dma.done.wait [#allocation3], 128  }
  0x52   :  { %1349 = vsyncadd [#allocation3], 4294967168 }
  0x53   :  { %1350 = dma.done.wait [#allocation6], 34816  }
  0x54   :  { %1351 = vsyncadd [#allocation6], 4294932480 }
  0x55   :  { %1352 = dma.done.wait [#allocation9], 384  }
  0x56   :  { %1353 = vsyncadd [#allocation9], 4294966912 }
  0x57   :  { %1354 = dma.done.wait [#allocation12], 2304  }
  0x58   :  { %1355 = vsyncadd [#allocation12], 4294964992  ;;  %v1373_v0 = vmov 0.0   ;;  %vm1374_vm0 = vmmov 0   ;;  %v146_v1 = vld [vmem:[#allocation5 + $0x78] sm:$0xff]  ;;  %v145_v2 = vld [vmem:[#allocation5 + $0x70] sm:$0xff] }
  0x59   :  { %1038 = vmatprep.subr.mxu0 %v1373_v0  ;;  %1070 = vmatprep.mubr.msk.f32.mxu0 %vm1374_vm0, %v1373_v0  ;;  %v144_v3 = vld [vmem:[#allocation5 + $0x68] sm:$0xff]  ;;  %v143_v4 = vld [vmem:[#allocation5 + $0x60] sm:$0xff]  ;;  %v142_v6 = vld [vmem:[#allocation5 + $0x58] sm:$0xff] }
  0x5a   :  { %1039 = vmatpush3.msra.mxu0 %v146_v1  ;;  %v287_v5 = vld [vmem:[#allocation7 + $0x1e8] sm:$0xff]  ;;  %v286_v7 = vld [vmem:[#allocation7 + $0x1e0] sm:$0xff]  ;;  %v141_v10 = vld [vmem:[#allocation5 + $0x50] sm:$0xff] }
  0x5b   :  { %1040 = vmatprep.subr.mxu0 %v1373_v0  ;;  %376 = vmatprep.subr.mxu1 %v287_v5  ;;  %v283_v8 = vld [vmem:[#allocation7 + $0x1c8] sm:$0xff]  ;;  %v282_v9 = vld [vmem:[#allocation7 + $0x1c0] sm:$0xff]  ;;  %v138_v20 = vld [vmem:[#allocation5 + $0x38] sm:$0xff] }
  0x5c   :  { %1041 = vmatpush3.msra.mxu0 %v145_v2  ;;  %377 = vmatpush1.msra.mxu1 %v286_v7  ;;  %v279_v11 = vld [vmem:[#allocation7 + $0x1a8] sm:$0xff]  ;;  %v278_v12 = vld [vmem:[#allocation7 + $0x1a0] sm:$0xff]  ;;  %v137_v23 = vld [vmem:[#allocation5 + $0x30] sm:$0xff] }
  0x5d   :  { %1042 = vmatprep.subr.mxu0 %v1373_v0  ;;  %378 = vmatprep.subr.mxu1 %v283_v8  ;;  %v275_v13 = vld [vmem:[#allocation7 + $0x188] sm:$0xff]  ;;  %v274_v15 = vld [vmem:[#allocation7 + $0x180] sm:$0xff]  ;;  %v134_v32 = vld [vmem:[#allocation5 + $0x18] sm:$0xff] }
  0x5e   :  { %1043 = vmatpush3.msra.mxu0 %v144_v3  ;;  %379 = vmatpush1.msra.mxu1 %v282_v9  ;;  %v140_v14 = vld [vmem:[#allocation5 + $0x48] sm:$0xff]  ;;  %v139_v17 = vld [vmem:[#allocation5 + $0x40] sm:$0xff]  ;;  %v133_v35 = vld [vmem:[#allocation5 + $0x10] sm:$0xff] }
  0x5f   :  { %1044 = vmatprep.subr.mxu0 %v1373_v0  ;;  %380 = vmatprep.subr.mxu1 %v279_v11  ;;  %v271_v16 = vld [vmem:[#allocation7 + $0x168] sm:$0xff]  ;;  %v270_v18 = vld [vmem:[#allocation7 + $0x160] sm:$0xff]  ;;  %v130_v43 = vld [vmem:[#allocation2] sm:$0xff] }
  0x60   :  { %1045 = vmatpush3.msra.mxu0 %v143_v4  ;;  %381 = vmatpush1.msra.mxu1 %v278_v12  ;;  %v267_v19 = vld [vmem:[#allocation7 + $0x148] sm:$0xff]  ;;  %v266_v21 = vld [vmem:[#allocation7 + $0x140] sm:$0xff]  ;;  %v289_v44 = vld [vmem:[#allocation7 + $0x1f8] sm:$0xff] }
  0x61   :  { %1046 = vmatprep.subr.mxu0 %v1373_v0  ;;  %382 = vmatprep.subr.mxu1 %v275_v13  ;;  %v263_v22 = vld [vmem:[#allocation7 + $0x128] sm:$0xff]  ;;  %v262_v24 = vld [vmem:[#allocation7 + $0x120] sm:$0xff]  ;;  %v288_v45 = vld [vmem:[#allocation7 + $0x1f0] sm:$0xff] }
  0x62   :  { %1047 = vmatpush3.msra.mxu0 %v142_v6  ;;  %383 = vmatpush1.msra.mxu1 %v274_v15  ;;  %v259_v25 = vld [vmem:[#allocation7 + $0x108] sm:$0xff]  ;;  %v258_v27 = vld [vmem:[#allocation7 + $0x100] sm:$0xff]  ;;  %v285_v47 = vld [vmem:[#allocation7 + $0x1d8] sm:$0xff] }
  0x63   :  { %1048 = vmatprep.subr.mxu0 %v1373_v0  ;;  %384 = vmatprep.subr.mxu1 %v271_v16  ;;  %v136_v26 = vld [vmem:[#allocation5 + $0x28] sm:$0xff]  ;;  %v135_v29 = vld [vmem:[#allocation5 + $0x20] sm:$0xff]  ;;  %v284_v49 = vld [vmem:[#allocation7 + $0x1d0] sm:$0xff] }
  0x64   :  { %1049 = vmatpush3.msra.mxu0 %v141_v10  ;;  %385 = vmatpush1.msra.mxu1 %v270_v18  ;;  %v255_v28 = vld [vmem:[#allocation7 + $0xe8] sm:$0xff]  ;;  %v254_v30 = vld [vmem:[#allocation7 + $0xe0] sm:$0xff]  ;;  %v281_v51 = vld [vmem:[#allocation7 + $0x1b8] sm:$0xff] }
  0x65   :  { %1050 = vmatprep.subr.mxu0 %v1373_v0  ;;  %386 = vmatprep.subr.mxu1 %v267_v19  ;;  %v251_v31 = vld [vmem:[#allocation7 + $0xc8] sm:$0xff]  ;;  %v250_v33 = vld [vmem:[#allocation7 + $0xc0] sm:$0xff]  ;;  %v280_v53 = vld [vmem:[#allocation7 + $0x1b0] sm:$0xff] }
  0x66   :  { %1051 = vmatpush3.msra.mxu0 %v140_v14  ;;  %387 = vmatpush1.msra.mxu1 %v266_v21  ;;  %v247_v34 = vld [vmem:[#allocation7 + $0xa8] sm:$0xff]  ;;  %v246_v36 = vld [vmem:[#allocation7 + $0xa0] sm:$0xff]  ;;  %v277_v55 = vld [vmem:[#allocation7 + $0x198] sm:$0xff] }
  0x67   :  { %1052 = vmatprep.subr.mxu0 %v1373_v0  ;;  %388 = vmatprep.subr.mxu1 %v263_v22  ;;  %v243_v37 = vld [vmem:[#allocation7 + $0x88] sm:$0xff]  ;;  %v242_v39 = vld [vmem:[#allocation7 + $0x80] sm:$0xff]  ;;  %v276_v57 = vld [vmem:[#allocation7 + $0x190] sm:$0xff] }
  0x68   :  { %1053 = vmatpush3.msra.mxu0 %v139_v17  ;;  %389 = vmatpush1.msra.mxu1 %v262_v24  ;;  %v132_v38 = vld [vmem:[#allocation5 + $0x8] sm:$0xff]  ;;  %v131_v41 = vld [vmem:[#allocation5] sm:$0xff]  ;;  %v273_v59 = vld [vmem:[#allocation7 + $0x178] sm:$0xff] }
  0x69   :  { %1054 = vmatprep.subr.mxu0 %v1373_v0  ;;  %390 = vmatprep.subr.mxu1 %v259_v25  ;;  %v239_v40 = vld [vmem:[#allocation7 + $0x68] sm:$0xff]  ;;  %v238_v42 = vld [vmem:[#allocation7 + $0x60] sm:$0xff]  ;;  %v272_v61 = vld [vmem:[#allocation7 + $0x170] sm:$0xff] }
  0x6a   :  { %1055 = vmatpush3.msra.mxu0 %v138_v20  ;;  %391 = vmatpush1.msra.mxu1 %v258_v27  ;;  %v235_v46 = vld [vmem:[#allocation7 + $0x48] sm:$0xff]  ;;  %v234_v48 = vld [vmem:[#allocation7 + $0x40] sm:$0xff]  ;;  %v269_v63 = vld [vmem:[#allocation7 + $0x158] sm:$0xff] }
  0x6b   :  { %1056 = vmatprep.subr.mxu0 %v1373_v0  ;;  %392 = vmatprep.subr.mxu1 %v255_v28  ;;  %v231_v50 = vld [vmem:[#allocation7 + $0x28] sm:$0xff]  ;;  %v230_v52 = vld [vmem:[#allocation7 + $0x20] sm:$0xff]  ;;  %v268_v2 = vld [vmem:[#allocation7 + $0x150] sm:$0xff] }
  0x6c   :  { %1057 = vmatpush3.msra.mxu0 %v137_v23  ;;  %393 = vmatpush1.msra.mxu1 %v254_v30  ;;  %v227_v54 = vld [vmem:[#allocation7 + $0x8] sm:$0xff]  ;;  %v226_v56 = vld [vmem:[#allocation7] sm:$0xff]  ;;  %v265_v4 = vld [vmem:[#allocation7 + $0x138] sm:$0xff] }
  0x6d   :  { %1058 = vmatprep.subr.mxu0 %v1373_v0  ;;  %394 = vmatprep.subr.mxu1 %v251_v31  ;;  %v351_v58 = vld [vmem:[#allocation7 + $0x3e8] sm:$0xff]  ;;  %v350_v60 = vld [vmem:[#allocation7 + $0x3e0] sm:$0xff]  ;;  %v264_v6 = vld [vmem:[#allocation7 + $0x130] sm:$0xff] }
  0x6e   :  { %1059 = vmatpush3.msra.mxu0 %v136_v26  ;;  %395 = vmatpush1.msra.mxu1 %v250_v33  ;;  %v347_v62 = vld [vmem:[#allocation7 + $0x3c8] sm:$0xff]  ;;  %v346_v1 = vld [vmem:[#allocation7 + $0x3c0] sm:$0xff]  ;;  %v261_v8 = vld [vmem:[#allocation7 + $0x118] sm:$0xff] }
  0x6f   :  { %1060 = vmatprep.subr.mxu0 %v1373_v0  ;;  %396 = vmatprep.subr.mxu1 %v247_v34  ;;  %v343_v3 = vld [vmem:[#allocation7 + $0x3a8] sm:$0xff]  ;;  %v342_v5 = vld [vmem:[#allocation7 + $0x3a0] sm:$0xff]  ;;  %v260_v10 = vld [vmem:[#allocation7 + $0x110] sm:$0xff] }
  0x70   :  { %1061 = vmatpush3.msra.mxu0 %v135_v29  ;;  %397 = vmatpush1.msra.mxu1 %v246_v36  ;;  %v339_v7 = vld [vmem:[#allocation7 + $0x388] sm:$0xff]  ;;  %v338_v9 = vld [vmem:[#allocation7 + $0x380] sm:$0xff]  ;;  %v257_v12 = vld [vmem:[#allocation7 + $0xf8] sm:$0xff] }
  0x71   :  { %1062 = vmatprep.subr.mxu0 %v1373_v0  ;;  %398 = vmatprep.subr.mxu1 %v243_v37  ;;  %v335_v11 = vld [vmem:[#allocation7 + $0x368] sm:$0xff]  ;;  %v334_v13 = vld [vmem:[#allocation7 + $0x360] sm:$0xff]  ;;  %v256_v14 = vld [vmem:[#allocation7 + $0xf0] sm:$0xff] }
  0x72   :  { %1063 = vmatpush3.msra.mxu0 %v134_v32  ;;  %399 = vmatpush1.msra.mxu1 %v242_v39  ;;  %v331_v15 = vld [vmem:[#allocation7 + $0x348] sm:$0xff]  ;;  %v253_v16 = vld [vmem:[#allocation7 + $0xd8] sm:$0xff]  ;;  %v330_v17 = vld [vmem:[#allocation7 + $0x340] sm:$0xff] }
  0x73   :  { %1064 = vmatprep.subr.mxu0 %v1373_v0  ;;  %400 = vmatprep.subr.mxu1 %v239_v40  ;;  %v252_v18 = vld [vmem:[#allocation7 + $0xd0] sm:$0xff]  ;;  %v327_v19 = vld [vmem:[#allocation7 + $0x328] sm:$0xff]  ;;  %v249_v20 = vld [vmem:[#allocation7 + $0xb8] sm:$0xff] }
  0x74   :  { %1065 = vmatpush3.msra.mxu0 %v133_v35  ;;  %401 = vmatpush1.msra.mxu1 %v238_v42  ;;  %v326_v21 = vld [vmem:[#allocation7 + $0x320] sm:$0xff]  ;;  %v248_v22 = vld [vmem:[#allocation7 + $0xb0] sm:$0xff]  ;;  %v323_v23 = vld [vmem:[#allocation7 + $0x308] sm:$0xff] }
  0x75   :  { %1066 = vmatprep.subr.mxu0 %v1373_v0  ;;  %402 = vmatprep.subr.mxu1 %v235_v46  ;;  %v245_v24 = vld [vmem:[#allocation7 + $0x98] sm:$0xff]  ;;  %v322_v25 = vld [vmem:[#allocation7 + $0x300] sm:$0xff]  ;;  %v244_v26 = vld [vmem:[#allocation7 + $0x90] sm:$0xff] }
  0x76   :  { %1067 = vmatpush3.msra.mxu0 %v132_v38  ;;  %403 = vmatpush1.msra.mxu1 %v234_v48  ;;  %v319_v27 = vld [vmem:[#allocation7 + $0x2e8] sm:$0xff]  ;;  %v241_v28 = vld [vmem:[#allocation7 + $0x78] sm:$0xff]  ;;  %v318_v29 = vld [vmem:[#allocation7 + $0x2e0] sm:$0xff] }
  0x77   :  { %1068 = vmatprep.subr.mxu0 %v1373_v0  ;;  %404 = vmatprep.subr.mxu1 %v231_v50  ;;  %v240_v30 = vld [vmem:[#allocation7 + $0x70] sm:$0xff]  ;;  %v315_v31 = vld [vmem:[#allocation7 + $0x2c8] sm:$0xff]  ;;  %v237_v32 = vld [vmem:[#allocation7 + $0x58] sm:$0xff] }
  0x78   :  { %1069 = vmatpush3.msra.mxu0 %v131_v41  ;;  %405 = vmatpush1.msra.mxu1 %v230_v52  ;;  %v314_v33 = vld [vmem:[#allocation7 + $0x2c0] sm:$0xff]  ;;  %v236_v34 = vld [vmem:[#allocation7 + $0x50] sm:$0xff]  ;;  %v311_v35 = vld [vmem:[#allocation7 + $0x2a8] sm:$0xff] }
  0x79   :  { %1071 = vmatmul.mubr.f32.vlgmr.msra.gmra.mxu0 %v130_v43  ;;  %447 = vmatprep.subr.mxu0 %v289_v44  ;;  %v233_v36 = vld [vmem:[#allocation7 + $0x38] sm:$0xff]  ;;  %v310_v37 = vld [vmem:[#allocation7 + $0x2a0] sm:$0xff]  ;;  %v232_v38 = vld [vmem:[#allocation7 + $0x30] sm:$0xff] }
  0x7a   :  { %448 = vmatpush1.msra.mxu0 %v288_v45  ;;  %406 = vmatprep.subr.mxu1 %v227_v54  ;;  %v307_v39 = vld [vmem:[#allocation7 + $0x288] sm:$0xff]  ;;  %v229_v40 = vld [vmem:[#allocation7 + $0x18] sm:$0xff]  ;;  %v306_v41 = vld [vmem:[#allocation7 + $0x280] sm:$0xff] }
  0x7b   :  { %449 = vmatprep.subr.mxu0 %v285_v47  ;;  %407 = vmatpush1.msra.mxu1 %v226_v56  ;;  %v228_v42 = vld [vmem:[#allocation7 + $0x10] sm:$0xff]  ;;  %v303_v43 = vld [vmem:[#allocation7 + $0x268] sm:$0xff]  ;;  %v353_v44 = vld [vmem:[#allocation7 + $0x3f8] sm:$0xff] }
  0x7c   :  { %450 = vmatpush1.msra.mxu0 %v284_v49  ;;  %408 = vmatprep.subr.mxu1 %v351_v58  ;;  %v302_v45 = vld [vmem:[#allocation7 + $0x260] sm:$0xff]  ;;  %v352_v46 = vld [vmem:[#allocation7 + $0x3f0] sm:$0xff]  ;;  %v299_v47 = vld [vmem:[#allocation7 + $0x248] sm:$0xff] }
  0x7d   :  { %451 = vmatprep.subr.mxu0 %v281_v51  ;;  %409 = vmatpush2.msra.mxu1 %v350_v60  ;;  %v349_v48 = vld [vmem:[#allocation7 + $0x3d8] sm:$0xff]  ;;  %v298_v49 = vld [vmem:[#allocation7 + $0x240] sm:$0xff]  ;;  %v348_v50 = vld [vmem:[#allocation7 + $0x3d0] sm:$0xff] }
  0x7e   :  { %452 = vmatpush1.msra.mxu0 %v280_v53  ;;  %410 = vmatprep.subr.mxu1 %v347_v62  ;;  %v295_v51 = vld [vmem:[#allocation7 + $0x228] sm:$0xff]  ;;  %v345_v52 = vld [vmem:[#allocation7 + $0x3b8] sm:$0xff]  ;;  %v344_v53 = vld [vmem:[#allocation7 + $0x3b0] sm:$0xff] }
  0x7f   :  { %453 = vmatprep.subr.mxu0 %v277_v55  ;;  %411 = vmatpush2.msra.mxu1 %v346_v1  ;;  %v341_v54 = vld [vmem:[#allocation7 + $0x398] sm:$0xff]  ;;  %v340_v55 = vld [vmem:[#allocation7 + $0x390] sm:$0xff] }
  0x80   :  { %454 = vmatpush1.msra.mxu0 %v276_v57  ;;  %412 = vmatprep.subr.mxu1 %v343_v3  ;;  %v337_v56 = vld [vmem:[#allocation7 + $0x378] sm:$0xff]  ;;  %v336_v57 = vld [vmem:[#allocation7 + $0x370] sm:$0xff] }
  0x81   :  { %455 = vmatprep.subr.mxu0 %v273_v59  ;;  %413 = vmatpush2.msra.mxu1 %v342_v5  ;;  %v333_v58 = vld [vmem:[#allocation7 + $0x358] sm:$0xff]  ;;  %v332_v59 = vld [vmem:[#allocation7 + $0x350] sm:$0xff] }
  0x82   :  { %456 = vmatpush1.msra.mxu0 %v272_v61  ;;  %414 = vmatprep.subr.mxu1 %v339_v7  ;;  %v329_v60 = vld [vmem:[#allocation7 + $0x338] sm:$0xff]  ;;  %v328_v61 = vld [vmem:[#allocation7 + $0x330] sm:$0xff] }
  0x83   :  { %457 = vmatprep.subr.mxu0 %v269_v63  ;;  %415 = vmatpush2.msra.mxu1 %v338_v9  ;;  %v325_v62 = vld [vmem:[#allocation7 + $0x318] sm:$0xff]  ;;  %v324_v63 = vld [vmem:[#allocation7 + $0x310] sm:$0xff] }
  0x84   :  { %458 = vmatpush1.msra.mxu0 %v268_v2  ;;  %416 = vmatprep.subr.mxu1 %v335_v11  ;;  %v321_v1 = vld [vmem:[#allocation7 + $0x2f8] sm:$0xff]  ;;  %v320_v2 = vld [vmem:[#allocation7 + $0x2f0] sm:$0xff] }
  0x85   :  { %459 = vmatprep.subr.mxu0 %v265_v4  ;;  %417 = vmatpush2.msra.mxu1 %v334_v13  ;;  %v317_v3 = vld [vmem:[#allocation7 + $0x2d8] sm:$0xff]  ;;  %v316_v4 = vld [vmem:[#allocation7 + $0x2d0] sm:$0xff] }
  0x86   :  { %460 = vmatpush1.msra.mxu0 %v264_v6  ;;  %418 = vmatprep.subr.mxu1 %v331_v15  ;;  %v313_v5 = vld [vmem:[#allocation7 + $0x2b8] sm:$0xff]  ;;  %v312_v6 = vld [vmem:[#allocation7 + $0x2b0] sm:$0xff] }
  0x87   :  { %461 = vmatprep.subr.mxu0 %v261_v8  ;;  %419 = vmatpush2.msra.mxu1 %v330_v17  ;;  %v309_v7 = vld [vmem:[#allocation7 + $0x298] sm:$0xff]  ;;  %v308_v8 = vld [vmem:[#allocation7 + $0x290] sm:$0xff] }
  0x88   :  { %462 = vmatpush1.msra.mxu0 %v260_v10  ;;  %420 = vmatprep.subr.mxu1 %v327_v19  ;;  %v305_v9 = vld [vmem:[#allocation7 + $0x278] sm:$0xff]  ;;  %v304_v10 = vld [vmem:[#allocation7 + $0x270] sm:$0xff]  ;;  %v224_v19 = vld [vmem:[#allocation10] sm:$0xff] }
  0x89   :  { %463 = vmatprep.subr.mxu0 %v257_v12  ;;  %421 = vmatpush2.msra.mxu1 %v326_v21  ;;  %v301_v11 = vld [vmem:[#allocation7 + $0x258] sm:$0xff]  ;;  %v300_v12 = vld [vmem:[#allocation7 + $0x250] sm:$0xff]  ;;  %v604_v21 = vld [vmem:[#allocation7 + $0x5e8] sm:$0xff] }
  0x8a   :  { %464 = vmatpush1.msra.mxu0 %v256_v14  ;;  %422 = vmatprep.subr.mxu1 %v323_v23  ;;  %v297_v13 = vld [vmem:[#allocation7 + $0x238] sm:$0xff]  ;;  %v294_v14 = vld [vmem:[#allocation7 + $0x220] sm:$0xff]  ;;  %v296_v15 = vld [vmem:[#allocation7 + $0x230] sm:$0xff] }
  0x8b   :  { %465 = vmatprep.subr.mxu0 %v253_v16  ;;  %423 = vmatpush2.msra.mxu1 %v322_v25  ;;  %v291_v16 = vld [vmem:[#allocation7 + $0x208] sm:$0xff]  ;;  %v293_v17 = vld [vmem:[#allocation7 + $0x218] sm:$0xff] }
  0x8c   :  { %466 = vmatpush1.msra.mxu0 %v252_v18  ;;  %424 = vmatprep.subr.mxu1 %v319_v27  ;;  %v290_v18 = vld [vmem:[#allocation7 + $0x200] sm:$0xff]  ;;  %v1002_v23 = vld [vmem:[%s1552_s2] ss:$0 sm:$0xff]  ;;  %v605_v27 = vld [vmem:[#allocation7 + $0x5f0] sm:$0xff]  ;;  %s1375_s2 = smov [#allocation15]  }
  0x8d   :  { %467 = vmatprep.subr.mxu0 %v249_v20  ;;  %425 = vmatpush2.msra.mxu1 %v318_v29  ;;  %v292_v20 = vld [vmem:[#allocation7 + $0x210] sm:$0xff]  ;;  %v600_v29 = vld [vmem:[#allocation7 + $0x5c8] sm:$0xff]  ;;  %s968_s16 = sshll.u32 %s1375_s2, 4  ;;  %s969_s16 = int_to_ptr.vmem [resolvable:$true] %s968_s16 }
  0x8e   :  { %468 = vmatpush1.msra.mxu0 %v248_v22  ;;  %426 = vmatprep.subr.mxu1 %v315_v31  ;;  %v606_v22 = vld [vmem:[#allocation7 + $0x5f8] sm:$0xff]  ;;  %v599_v31 = vld [vmem:[#allocation7 + $0x5c0] sm:$0xff]  ;;  %s1288_s17 = scalar_lea.vmem %s969_s16, 256  ;;  %p1293_p8 = scmp.lt.s32.totalorder %s969_s16, %s969_s16 }
  0x8f   :  { %469 = vmatprep.subr.mxu0 %v245_v24  ;;  %427 = vmatpush2.msra.mxu1 %v314_v33  ;;  %v596_v33 = vld [vmem:[#allocation7 + $0x5a8] sm:$0xff]  ;;  %p1289_p7 = scmp.ne.s32.totalorder %s969_s16, %s1288_s17  ;;  %p1294_p9 = scmp.lt.s32.totalorder %s1288_s17, %s1288_s17 }
  0x90   :  { %470 = vmatpush1.msra.mxu0 %v244_v26  ;;  %428 = vmatprep.subr.mxu1 %v311_v35  ;;  %v603_v26 = vld [vmem:[#allocation7 + $0x5e0] sm:$0xff] }
  0x91   :  { %471 = vmatprep.subr.mxu0 %v241_v28  ;;  %429 = vmatpush2.msra.mxu1 %v310_v37  ;;  %v595_v35 = vld [vmem:[#allocation7 + $0x5a0] sm:$0xff]  ;;  %v592_v37 = vld [vmem:[#allocation7 + $0x588] sm:$0xff]  ;;  %p1295_p10 = por %p1294_p9, %p1293_p8 }
  0x92   :  { %472 = vmatpush1.msra.mxu0 %v240_v30  ;;  %430 = vmatprep.subr.mxu1 %v307_v39  ;;  %v602_v30 = vld [vmem:[#allocation7 + $0x5d8] sm:$0xff]  ;;  %v591_v39 = vld [vmem:[#allocation7 + $0x580] sm:$0xff] }
  0x93   :  { %473 = vmatprep.subr.mxu0 %v237_v32  ;;  %431 = vmatpush2.msra.mxu1 %v306_v41  ;;  %v601_v32 = vld [vmem:[#allocation7 + $0x5d0] sm:$0xff]  ;;  %v588_v41 = vld [vmem:[#allocation7 + $0x568] sm:$0xff]  ;;  %p1296_p11 = pnand %p1295_p10, %p1289_p7 }
  0x94   :  { %474 = vmatpush1.msra.mxu0 %v236_v34  ;;  %432 = vmatprep.subr.mxu1 %v303_v43  ;;  %v598_v34 = vld [vmem:[#allocation7 + $0x5b8] sm:$0xff]  ;;  %v587_v43 = vld [vmem:[#allocation7 + $0x560] sm:$0xff] }
  0x95   :  { %475 = vmatprep.subr.mxu0 %v233_v36  ;;  %433 = vmatpush2.msra.mxu1 %v302_v45  ;;  %v597_v36 = vld [vmem:[#allocation7 + $0x5b0] sm:$0xff]  ;;  %v584_v45 = vld [vmem:[#allocation7 + $0x548] sm:$0xff] }
  0x96   :  { %476 = vmatpush1.msra.mxu0 %v232_v38  ;;  %434 = vmatprep.subr.mxu1 %v299_v47  ;;  %v594_v38 = vld [vmem:[#allocation7 + $0x598] sm:$0xff]  ;;  %v583_v47 = vld [vmem:[#allocation7 + $0x540] sm:$0xff] }
  0x97   :  { %477 = vmatprep.subr.mxu0 %v229_v40  ;;  %435 = vmatpush2.msra.mxu1 %v298_v49  ;;  %v593_v40 = vld [vmem:[#allocation7 + $0x590] sm:$0xff]  ;;  %v580_v49 = vld [vmem:[#allocation7 + $0x528] sm:$0xff] }
  0x98   :  { %478 = vmatpush1.msra.mxu0 %v228_v42  ;;  %436 = vmatprep.subr.mxu1 %v295_v51  ;;  %v590_v42 = vld [vmem:[#allocation7 + $0x578] sm:$0xff]  ;;  %v579_v51 = vld [vmem:[#allocation7 + $0x520] sm:$0xff] }
  0x99   :  { %479 = vmatprep.subr.mxu0 %v353_v44  ;;  %437 = vmatpush2.msra.mxu1 %v294_v14  ;;  %v589_v44 = vld [vmem:[#allocation7 + $0x570] sm:$0xff]  ;;  %v552_v14 = vld [vmem:[#allocation7 + $0x448] sm:$0xff] }
  0x9a   :  { %480 = vmatpush2.msra.mxu0 %v352_v46  ;;  %438 = vmatprep.subr.mxu1 %v291_v16  ;;  %v586_v46 = vld [vmem:[#allocation7 + $0x558] sm:$0xff]  ;;  %v551_v16 = vld [vmem:[#allocation7 + $0x440] sm:$0xff] }
  0x9b   :  { %481 = vmatprep.subr.mxu0 %v349_v48  ;;  %439 = vmatpush2.msra.mxu1 %v290_v18  ;;  %v585_v48 = vld [vmem:[#allocation7 + $0x550] sm:$0xff]  ;;  %v548_v18 = vld [vmem:[#allocation7 + $0x428] sm:$0xff] }
  0x9c   :  { %482 = vmatpush2.msra.mxu0 %v348_v50  ;;  %440 = vmatprep.mubr.f32.mxu1 %v224_v19  ;;  %v582_v50 = vld [vmem:[#allocation7 + $0x538] sm:$0xff] }
  0x9d   :  { %483 = vmatprep.subr.mxu0 %v345_v52  ;;  %511 = vmatprep.mubr.f32.mxu0 %v224_v19  ;;  %v581_v52 = vld [vmem:[#allocation7 + $0x530] sm:$0xff]  ;;  %v550_v19 = vld [vmem:[#allocation7 + $0x438] sm:$0xff] }
  0x9e   :  { %484 = vmatpush2.msra.mxu0 %v344_v53  ;;  %694 = vmatprep.subr.mxu1 %v604_v21  ;;  %v576_v53 = vld [vmem:[#allocation7 + $0x508] sm:$0xff]  ;;  %v549_v21 = vld [vmem:[#allocation7 + $0x430] sm:$0xff] }
  0x9f   :  { %485 = vmatprep.subr.mxu0 %v341_v54  ;;  %v578_v54 = vld [vmem:[#allocation7 + $0x518] sm:$0xff] }
  0xa0   :  { %486 = vmatpush2.msra.mxu0 %v340_v55  ;;  %v575_v55 = vld [vmem:[#allocation7 + $0x500] sm:$0xff] }
  0xa1   :  { %487 = vmatprep.subr.mxu0 %v337_v56  ;;  %v577_v56 = vld [vmem:[#allocation7 + $0x510] sm:$0xff] }
  0xa2   :  { %488 = vmatpush2.msra.mxu0 %v336_v57  ;;  %v572_v57 = vld [vmem:[#allocation7 + $0x4e8] sm:$0xff] }
  0xa3   :  { %489 = vmatprep.subr.mxu0 %v333_v58  ;;  %v574_v58 = vld [vmem:[#allocation7 + $0x4f8] sm:$0xff] }
  0xa4   :  { %490 = vmatpush2.msra.mxu0 %v332_v59  ;;  %v571_v59 = vld [vmem:[#allocation7 + $0x4e0] sm:$0xff] }
  0xa5   :  { %491 = vmatprep.subr.mxu0 %v329_v60  ;;  %v573_v60 = vld [vmem:[#allocation7 + $0x4f0] sm:$0xff] }
  0xa6   :  { %492 = vmatpush2.msra.mxu0 %v328_v61  ;;  %v568_v61 = vld [vmem:[#allocation7 + $0x4c8] sm:$0xff] }
  0xa7   :  { %493 = vmatprep.subr.mxu0 %v325_v62  ;;  %v570_v62 = vld [vmem:[#allocation7 + $0x4d8] sm:$0xff] }
  0xa8   :  { %494 = vmatpush2.msra.mxu0 %v324_v63  ;;  %v567_v63 = vld [vmem:[#allocation7 + $0x4c0] sm:$0xff] }
  0xa9   :  { %495 = vmatprep.subr.mxu0 %v321_v1  ;;  %v569_v1 = vld [vmem:[#allocation7 + $0x4d0] sm:$0xff] }
  0xaa   :  { %496 = vmatpush2.msra.mxu0 %v320_v2  ;;  %v564_v2 = vld [vmem:[#allocation7 + $0x4a8] sm:$0xff] }
  0xab   :  { %497 = vmatprep.subr.mxu0 %v317_v3  ;;  %v566_v3 = vld [vmem:[#allocation7 + $0x4b8] sm:$0xff] }
  0xac   :  { %498 = vmatpush2.msra.mxu0 %v316_v4  ;;  %v563_v4 = vld [vmem:[#allocation7 + $0x4a0] sm:$0xff] }
  0xad   :  { %499 = vmatprep.subr.mxu0 %v313_v5  ;;  %v565_v5 = vld [vmem:[#allocation7 + $0x4b0] sm:$0xff] }
  0xae   :  { %500 = vmatpush2.msra.mxu0 %v312_v6  ;;  %v560_v6 = vld [vmem:[#allocation7 + $0x488] sm:$0xff] }
  0xaf   :  { %501 = vmatprep.subr.mxu0 %v309_v7  ;;  %v562_v7 = vld [vmem:[#allocation7 + $0x498] sm:$0xff] }
  0xb0   :  { %502 = vmatpush2.msra.mxu0 %v308_v8  ;;  %v559_v8 = vld [vmem:[#allocation7 + $0x480] sm:$0xff] }
  0xb1   :  { %503 = vmatprep.subr.mxu0 %v305_v9  ;;  %v561_v9 = vld [vmem:[#allocation7 + $0x490] sm:$0xff] }
  0xb2   :  { %504 = vmatpush2.msra.mxu0 %v304_v10  ;;  %v556_v10 = vld [vmem:[#allocation7 + $0x468] sm:$0xff] }
  0xb3   :  { %505 = vmatprep.subr.mxu0 %v301_v11  ;;  %v558_v11 = vld [vmem:[#allocation7 + $0x478] sm:$0xff] }
  0xb4   :  { %506 = vmatpush2.msra.mxu0 %v300_v12  ;;  %v555_v12 = vld [vmem:[#allocation7 + $0x460] sm:$0xff] }
  0xb5   :  { %507 = vmatprep.subr.mxu0 %v297_v13  ;;  %v557_v13 = vld [vmem:[#allocation7 + $0x470] sm:$0xff] }
  0xb6   :  { %508 = vmatpush2.msra.mxu0 %v296_v15  ;;  %v554_v15 = vld [vmem:[#allocation7 + $0x458] sm:$0xff] }
  0xb7   :  { %509 = vmatprep.subr.mxu0 %v293_v17  ;;  %v553_v17 = vld [vmem:[#allocation7 + $0x450] sm:$0xff] }
  0xb8   :  { %510 = vmatpush2.msra.mxu0 %v292_v20  ;;  %v547_v20 = vld [vmem:[#allocation7 + $0x420] sm:$0xff] }
  0xb9   :  { %765 = vmatprep.subr.mxu0 %v606_v22  ;;  %v544_v22 = vld [vmem:[#allocation7 + $0x408] sm:$0xff] }
 0x139   :  { %v220_v24 = vpop.f32.mrf.mxu0 }
 0x13a   :  { %v221_v25 = vadd.f32 %v1002_v23, %v220_v24  ;;  %v546_v23 = vld [vmem:[#allocation7 + $0x418] sm:$0xff]  ;;  %v543_v24 = vld [vmem:[#allocation7 + $0x400] sm:$0xff] }
 0x13b   :  { %v1072_v28 = vpop.f32.mrf.mxu0 }
 0x13c   :  { %441 = vmatmul.mubr.f32.vlgmr.msra.gmra.mxu1 %v221_v25  ;;  %512 = vmatmul.mubr.f32.vlgmr.msra.gmra.mxu0 %v221_v25  ;;  %v545_v25 = vld [vmem:[#allocation7 + $0x410] sm:$0xff]  ;;  %v667_v28 = vld [vmem:[#allocation7 + $0x7e0] sm:$0xff] }
 0x13d   :  { %695 = vmatpush1.msra.mxu1 %v603_v26  ;;  %766 = vmatpush1.msra.mxu0 %v605_v27  ;;  %v668_v26 = vld [vmem:[#allocation7 + $0x7e8] sm:$0xff]  ;;  %v670_v27 = vld [vmem:[#allocation7 + $0x7f8] sm:$0xff] }
 0x13e   :  { %696 = vmatprep.subr.mxu1 %v600_v29  ;;  %767 = vmatprep.subr.mxu0 %v602_v30  ;;  %v669_v29 = vld [vmem:[#allocation7 + $0x7f0] sm:$0xff]  ;;  %v664_v30 = vld [vmem:[#allocation7 + $0x7c8] sm:$0xff] }
 0x13f   :  { %697 = vmatpush1.msra.mxu1 %v599_v31  ;;  %768 = vmatpush1.msra.mxu0 %v601_v32  ;;  %v666_v31 = vld [vmem:[#allocation7 + $0x7d8] sm:$0xff]  ;;  %v663_v32 = vld [vmem:[#allocation7 + $0x7c0] sm:$0xff] }
 0x140   :  { %698 = vmatprep.subr.mxu1 %v596_v33  ;;  %769 = vmatprep.subr.mxu0 %v598_v34  ;;  %v665_v33 = vld [vmem:[#allocation7 + $0x7d0] sm:$0xff]  ;;  %v660_v34 = vld [vmem:[#allocation7 + $0x7a8] sm:$0xff] }
 0x141   :  { %699 = vmatpush1.msra.mxu1 %v595_v35  ;;  %770 = vmatpush1.msra.mxu0 %v597_v36  ;;  %v662_v35 = vld [vmem:[#allocation7 + $0x7b8] sm:$0xff]  ;;  %v659_v36 = vld [vmem:[#allocation7 + $0x7a0] sm:$0xff] }
 0x142   :  { %700 = vmatprep.subr.mxu1 %v592_v37  ;;  %771 = vmatprep.subr.mxu0 %v594_v38  ;;  %v661_v37 = vld [vmem:[#allocation7 + $0x7b0] sm:$0xff]  ;;  %v656_v38 = vld [vmem:[#allocation7 + $0x788] sm:$0xff] }
 0x143   :  { %701 = vmatpush1.msra.mxu1 %v591_v39  ;;  %772 = vmatpush1.msra.mxu0 %v593_v40  ;;  %v658_v39 = vld [vmem:[#allocation7 + $0x798] sm:$0xff]  ;;  %v655_v40 = vld [vmem:[#allocation7 + $0x780] sm:$0xff] }
 0x144   :  { %702 = vmatprep.subr.mxu1 %v588_v41  ;;  %773 = vmatprep.subr.mxu0 %v590_v42  ;;  %v657_v41 = vld [vmem:[#allocation7 + $0x790] sm:$0xff]  ;;  %v652_v42 = vld [vmem:[#allocation7 + $0x768] sm:$0xff] }
 0x145   :  { %703 = vmatpush1.msra.mxu1 %v587_v43  ;;  %774 = vmatpush1.msra.mxu0 %v589_v44  ;;  %v654_v43 = vld [vmem:[#allocation7 + $0x778] sm:$0xff]  ;;  %v651_v44 = vld [vmem:[#allocation7 + $0x760] sm:$0xff] }
 0x146   :  { %704 = vmatprep.subr.mxu1 %v584_v45  ;;  %775 = vmatprep.subr.mxu0 %v586_v46  ;;  %v653_v45 = vld [vmem:[#allocation7 + $0x770] sm:$0xff]  ;;  %v648_v46 = vld [vmem:[#allocation7 + $0x748] sm:$0xff] }
 0x147   :  { %705 = vmatpush1.msra.mxu1 %v583_v47  ;;  %776 = vmatpush1.msra.mxu0 %v585_v48  ;;  %v650_v47 = vld [vmem:[#allocation7 + $0x758] sm:$0xff]  ;;  %v647_v48 = vld [vmem:[#allocation7 + $0x740] sm:$0xff] }
 0x148   :  { %706 = vmatprep.subr.mxu1 %v580_v49  ;;  %777 = vmatprep.subr.mxu0 %v582_v50  ;;  %v649_v49 = vld [vmem:[#allocation7 + $0x750] sm:$0xff]  ;;  %v644_v50 = vld [vmem:[#allocation7 + $0x728] sm:$0xff] }
 0x149   :  { %707 = vmatpush1.msra.mxu1 %v579_v51  ;;  %778 = vmatpush1.msra.mxu0 %v581_v52  ;;  %v646_v51 = vld [vmem:[#allocation7 + $0x738] sm:$0xff]  ;;  %v643_v52 = vld [vmem:[#allocation7 + $0x720] sm:$0xff] }
 0x14a   :  { %708 = vmatprep.subr.mxu1 %v576_v53  ;;  %779 = vmatprep.subr.mxu0 %v578_v54  ;;  %v645_v53 = vld [vmem:[#allocation7 + $0x730] sm:$0xff]  ;;  %v640_v54 = vld [vmem:[#allocation7 + $0x708] sm:$0xff] }
 0x14b   :  { %709 = vmatpush1.msra.mxu1 %v575_v55  ;;  %780 = vmatpush1.msra.mxu0 %v577_v56  ;;  %v642_v55 = vld [vmem:[#allocation7 + $0x718] sm:$0xff]  ;;  %v639_v56 = vld [vmem:[#allocation7 + $0x700] sm:$0xff] }
 0x14c   :  { %710 = vmatprep.subr.mxu1 %v572_v57  ;;  %781 = vmatprep.subr.mxu0 %v574_v58  ;;  %v641_v57 = vld [vmem:[#allocation7 + $0x710] sm:$0xff]  ;;  %v636_v58 = vld [vmem:[#allocation7 + $0x6e8] sm:$0xff] }
 0x14d   :  { %711 = vmatpush1.msra.mxu1 %v571_v59  ;;  %782 = vmatpush1.msra.mxu0 %v573_v60  ;;  %v638_v59 = vld [vmem:[#allocation7 + $0x6f8] sm:$0xff]  ;;  %v635_v60 = vld [vmem:[#allocation7 + $0x6e0] sm:$0xff] }
 0x14e   :  { %712 = vmatprep.subr.mxu1 %v568_v61  ;;  %783 = vmatprep.subr.mxu0 %v570_v62  ;;  %v637_v61 = vld [vmem:[#allocation7 + $0x6f0] sm:$0xff]  ;;  %v632_v62 = vld [vmem:[#allocation7 + $0x6c8] sm:$0xff] }
 0x14f   :  { %713 = vmatpush1.msra.mxu1 %v567_v63  ;;  %784 = vmatpush1.msra.mxu0 %v569_v1  ;;  %v634_v63 = vld [vmem:[#allocation7 + $0x6d8] sm:$0xff]  ;;  %v631_v1 = vld [vmem:[#allocation7 + $0x6c0] sm:$0xff] }
 0x150   :  { %714 = vmatprep.subr.mxu1 %v564_v2  ;;  %785 = vmatprep.subr.mxu0 %v566_v3  ;;  %v633_v2 = vld [vmem:[#allocation7 + $0x6d0] sm:$0xff]  ;;  %v628_v3 = vld [vmem:[#allocation7 + $0x6a8] sm:$0xff] }
 0x151   :  { %715 = vmatpush1.msra.mxu1 %v563_v4  ;;  %786 = vmatpush1.msra.mxu0 %v565_v5  ;;  %v630_v4 = vld [vmem:[#allocation7 + $0x6b8] sm:$0xff]  ;;  %v627_v5 = vld [vmem:[#allocation7 + $0x6a0] sm:$0xff] }
 0x152   :  { %716 = vmatprep.subr.mxu1 %v560_v6  ;;  %787 = vmatprep.subr.mxu0 %v562_v7  ;;  %v629_v6 = vld [vmem:[#allocation7 + $0x6b0] sm:$0xff]  ;;  %v624_v7 = vld [vmem:[#allocation7 + $0x688] sm:$0xff] }
 0x153   :  { %717 = vmatpush1.msra.mxu1 %v559_v8  ;;  %788 = vmatpush1.msra.mxu0 %v561_v9  ;;  %v626_v8 = vld [vmem:[#allocation7 + $0x698] sm:$0xff]  ;;  %v623_v9 = vld [vmem:[#allocation7 + $0x680] sm:$0xff] }
 0x154   :  { %718 = vmatprep.subr.mxu1 %v556_v10  ;;  %789 = vmatprep.subr.mxu0 %v558_v11  ;;  %v625_v10 = vld [vmem:[#allocation7 + $0x690] sm:$0xff]  ;;  %v620_v11 = vld [vmem:[#allocation7 + $0x668] sm:$0xff] }
 0x155   :  { %719 = vmatpush1.msra.mxu1 %v555_v12  ;;  %790 = vmatpush1.msra.mxu0 %v557_v13  ;;  %v622_v12 = vld [vmem:[#allocation7 + $0x678] sm:$0xff]  ;;  %v619_v13 = vld [vmem:[#allocation7 + $0x660] sm:$0xff] }
 0x156   :  { %720 = vmatprep.subr.mxu1 %v552_v14  ;;  %791 = vmatprep.subr.mxu0 %v554_v15  ;;  %v621_v14 = vld [vmem:[#allocation7 + $0x670] sm:$0xff]  ;;  %v616_v15 = vld [vmem:[#allocation7 + $0x648] sm:$0xff] }
 0x157   :  { %721 = vmatpush1.msra.mxu1 %v551_v16  ;;  %792 = vmatpush1.msra.mxu0 %v553_v17  ;;  %v618_v16 = vld [vmem:[#allocation7 + $0x658] sm:$0xff]  ;;  %v615_v17 = vld [vmem:[#allocation7 + $0x640] sm:$0xff] }
 0x158   :  { %722 = vmatprep.subr.mxu1 %v548_v18  ;;  %793 = vmatprep.subr.mxu0 %v550_v19  ;;  %v617_v18 = vld [vmem:[#allocation7 + $0x650] sm:$0xff]  ;;  %v612_v19 = vld [vmem:[#allocation7 + $0x628] sm:$0xff] }
 0x159   :  { %723 = vmatpush1.msra.mxu1 %v547_v20  ;;  %794 = vmatpush1.msra.mxu0 %v549_v21  ;;  %v614_v20 = vld [vmem:[#allocation7 + $0x638] sm:$0xff]  ;;  %v611_v21 = vld [vmem:[#allocation7 + $0x620] sm:$0xff] }
 0x15a   :  { %724 = vmatprep.subr.mxu1 %v544_v22  ;;  %795 = vmatprep.subr.mxu0 %v546_v23  ;;  %v613_v22 = vld [vmem:[#allocation7 + $0x630] sm:$0xff]  ;;  %v608_v23 = vld [vmem:[#allocation7 + $0x608] sm:$0xff] }
 0x15b   :  { %725 = vmatpush1.msra.mxu1 %v543_v24  ;;  %796 = vmatpush1.msra.mxu0 %v545_v25  ;;  %v610_v24 = vld [vmem:[#allocation7 + $0x618] sm:$0xff]  ;;  %v607_v25 = vld [vmem:[#allocation7 + $0x600] sm:$0xff] }
 0x15c   :  { %726 = vmatprep.subr.mxu1 %v668_v26  ;;  %797 = vmatprep.subr.mxu0 %v670_v27  ;;  %v539_v26 = vld [vmem:[#allocation10 + $0x8] sm:$0xff] }
 0x15d   :  { %727 = vmatpush2.msra.mxu1 %v667_v28  ;;  %798 = vmatpush2.msra.mxu0 %v669_v29  ;;  %v609_v27 = vld [vmem:[#allocation7 + $0x610] sm:$0xff]  ;;  %v356_v28 = vlaneseq }
 0x15e   :  { %728 = vmatprep.subr.mxu1 %v664_v30  ;;  %799 = vmatprep.subr.mxu0 %v666_v31  ;;  %v354_v31 = vld [vmem:[#allocation8] sm:$0xf] }
 0x15f   :  { %729 = vmatpush2.msra.mxu1 %v663_v32  ;;  %800 = vmatpush2.msra.mxu0 %v665_v33  ;;  %v1493_v29 = vshrl.u32 %v356_v28, 7 }
 0x160   :  { %730 = vmatprep.subr.mxu1 %v660_v34  ;;  %801 = vmatprep.subr.mxu0 %v662_v35 }
 0x161   :  { %731 = vmatpush2.msra.mxu1 %v659_v36  ;;  %802 = vmatpush2.msra.mxu0 %v661_v37  ;;  %v358_v30 = vsub.s32 0, %v1493_v29  ;;  %v362_v32 = vsub.s32 1, %v1493_v29  ;;  %v366_v34 = vsub.s32 2, %v1493_v29 }
 0x162   :  { %732 = vmatprep.subr.mxu1 %v656_v38  ;;  %803 = vmatprep.subr.mxu0 %v658_v39 }
 0x163   :  { %733 = vmatpush2.msra.mxu1 %v655_v40  ;;  %804 = vmatpush2.msra.mxu0 %v657_v41  ;;  %v359_v33 = vrot.slane %v354_v31, %v358_v30  ;;  %v363_v35 = vrot.slane %v354_v31, %v362_v32  ;;  %v367_v40 = vrot.slane %v354_v31, %v366_v34 }
 0x164   :  { %734 = vmatprep.subr.mxu1 %v652_v42  ;;  %805 = vmatprep.subr.mxu0 %v654_v43 }
 0x165   :  { %735 = vmatpush2.msra.mxu1 %v651_v44  ;;  %806 = vmatpush2.msra.mxu0 %v653_v45  ;;  %v370_v44 = vsub.s32 3, %v1493_v29 }
 0x166   :  { %736 = vmatprep.subr.mxu1 %v648_v46  ;;  %807 = vmatprep.subr.mxu0 %v650_v47 }
 0x167   :  { %737 = vmatpush2.msra.mxu1 %v647_v48  ;;  %808 = vmatpush2.msra.mxu0 %v649_v49  ;;  %v371_v46 = vrot.slane %v354_v31, %v370_v44 }
 0x168   :  { %738 = vmatprep.subr.mxu1 %v644_v50  ;;  %809 = vmatprep.subr.mxu0 %v646_v51 }
 0x169   :  { %739 = vmatpush2.msra.mxu1 %v643_v52  ;;  %810 = vmatpush2.msra.mxu0 %v645_v53 }
 0x16a   :  { %740 = vmatprep.subr.mxu1 %v640_v54  ;;  %811 = vmatprep.subr.mxu0 %v642_v55  ;;  %v225_v55 = vld [vmem:[#allocation11] sm:$0xff] }
 0x16b   :  { %741 = vmatpush2.msra.mxu1 %v639_v56  ;;  %812 = vmatpush2.msra.mxu0 %v641_v57 }
 0x16c   :  { %742 = vmatprep.subr.mxu1 %v636_v58  ;;  %813 = vmatprep.subr.mxu0 %v638_v59 }
 0x16d   :  { %743 = vmatpush2.msra.mxu1 %v635_v60  ;;  %814 = vmatpush2.msra.mxu0 %v637_v61 }
 0x16e   :  { %744 = vmatprep.subr.mxu1 %v632_v62  ;;  %815 = vmatprep.subr.mxu0 %v634_v63 }
 0x16f   :  { %745 = vmatpush2.msra.mxu1 %v631_v1  ;;  %816 = vmatpush2.msra.mxu0 %v633_v2 }
 0x170   :  { %746 = vmatprep.subr.mxu1 %v628_v3  ;;  %817 = vmatprep.subr.mxu0 %v630_v4  ;;  %v873_v3 = vld [vmem:[#allocation13 + $0x78] sm:$0xff]  ;;  %v872_v4 = vld [vmem:[#allocation13 + $0x70] sm:$0xff] }
 0x171   :  { %747 = vmatpush2.msra.mxu1 %v627_v5  ;;  %818 = vmatpush2.msra.mxu0 %v629_v6  ;;  %v871_v5 = vld [vmem:[#allocation13 + $0x68] sm:$0xff]  ;;  %v870_v6 = vld [vmem:[#allocation13 + $0x60] sm:$0xff] }
 0x172   :  { %748 = vmatprep.subr.mxu1 %v624_v7  ;;  %819 = vmatprep.subr.mxu0 %v626_v8  ;;  %v869_v7 = vld [vmem:[#allocation13 + $0x58] sm:$0xff]  ;;  %v868_v8 = vld [vmem:[#allocation13 + $0x50] sm:$0xff] }
 0x173   :  { %749 = vmatpush2.msra.mxu1 %v623_v9  ;;  %820 = vmatpush2.msra.mxu0 %v625_v10  ;;  %v867_v9 = vld [vmem:[#allocation13 + $0x48] sm:$0xff]  ;;  %v866_v10 = vld [vmem:[#allocation13 + $0x40] sm:$0xff] }
 0x174   :  { %750 = vmatprep.subr.mxu1 %v620_v11  ;;  %821 = vmatprep.subr.mxu0 %v622_v12  ;;  %v865_v11 = vld [vmem:[#allocation13 + $0x38] sm:$0xff]  ;;  %v864_v12 = vld [vmem:[#allocation13 + $0x30] sm:$0xff] }
 0x175   :  { %751 = vmatpush2.msra.mxu1 %v619_v13  ;;  %822 = vmatpush2.msra.mxu0 %v621_v14  ;;  %v863_v13 = vld [vmem:[#allocation13 + $0x28] sm:$0xff]  ;;  %v862_v14 = vld [vmem:[#allocation13 + $0x20] sm:$0xff] }
 0x176   :  { %752 = vmatprep.subr.mxu1 %v616_v15  ;;  %823 = vmatprep.subr.mxu0 %v618_v16  ;;  %v861_v15 = vld [vmem:[#allocation13 + $0x18] sm:$0xff]  ;;  %v860_v16 = vld [vmem:[#allocation13 + $0x10] sm:$0xff] }
 0x177   :  { %753 = vmatpush2.msra.mxu1 %v615_v17  ;;  %824 = vmatpush2.msra.mxu0 %v617_v18  ;;  %v859_v17 = vld [vmem:[#allocation13 + $0x8] sm:$0xff]  ;;  %v858_v18 = vld [vmem:[#allocation13] sm:$0xff] }
 0x178   :  { %754 = vmatprep.subr.mxu1 %v612_v19  ;;  %825 = vmatprep.subr.mxu0 %v614_v20  ;;  %v672_v19 = vld [vmem:[#allocation8 + $0x4] sm:$0xf] }
 0x179   :  { %755 = vmatpush2.msra.mxu1 %v611_v21  ;;  %826 = vmatpush2.msra.mxu0 %v613_v22  ;;  %v677_v20 = vrot.slane %v672_v19, %v358_v30  ;;  %v681_v21 = vrot.slane %v672_v19, %v362_v32 }
 0x17a   :  { %756 = vmatprep.subr.mxu1 %v608_v23  ;;  %827 = vmatprep.subr.mxu0 %v610_v24 }
 0x17b   :  { %757 = vmatpush2.msra.mxu1 %v607_v25  ;;  %758 = vmatprep.mubr.f32.mxu1 %v539_v26 }
 0x17c   :  { %828 = vmatpush2.msra.mxu0 %v609_v27  ;;  %829 = vmatprep.mubr.f32.mxu0 %v539_v26  ;;  %v685_v26 = vrot.slane %v672_v19, %v366_v34  ;;  %v541_v34 = vld [vmem:[#allocation11 + $0x8] sm:$0xff] }
 0x17d   :  { %1073 = vmatprep.subr.mxu1 %v1373_v0 }
 0x1fc   :  { %v442_v36 = vpop.f32.mrf.mxu1  ;;  %v513_v42 = vpop.f32.mrf.mxu0 }
 0x1fd   :  { %v443_v37 = vadd.f32 %v442_v36, %v359_v33  ;;  %v514_v45 = vadd.f32 %v513_v42, %v367_v40  ;;  %v689_v33 = vrot.slane %v672_v19, %v370_v44 }
 0x1fe   :  { %v444_v38 = vpop.f32.mrf.mxu1  ;;  %v515_v47 = vpop.f32.mrf.mxu0 }
 0x1ff   :  { %v518_v39 = vmul.f32 0.5, %v443_v37  ;;  %v445_v41 = vadd.f32 %v444_v38, %v363_v35  ;;  %v516_v48 = vadd.f32 %v515_v47, %v371_v46 }
 0x201   :  { %1126 = vtanh.f32 %v518_v39  ;;  %v522_v43 = vmul.f32 0.5, %v445_v41  ;;  %v527_v49 = vmul.f32 0.5, %v516_v48 }
 0x203   :  { %1128 = vtanh.f32 %v522_v43 }
 0x204   :  { %1130 = vtanh.f32 %v514_v45 }
 0x205   :  { %1132 = vtanh.f32 %v527_v49 }
 0x20e   :  { %v1127_v50 = vpop.eup %1126 }
 0x20f   :  { %v520_v51 = vmul.f32 0.5, %v1127_v50 }
 0x210   :  { %v1129_v52 = vpop.eup %1128 }
 0x211   :  { %v521_v53 = vadd.f32 0.5, %v520_v51  ;;  %v524_v54 = vmul.f32 0.5, %v1129_v52  ;;  %v1131_v57 = vpop.eup %1130 }
 0x212   :  { %v1133_v61 = vpop.eup %1132 }
 0x213   :  { %v525_v56 = vadd.f32 0.5, %v524_v54  ;;  %v532_v59 = vmul.f32 %v1131_v57, %v521_v53  ;;  %v529_v62 = vmul.f32 0.5, %v1133_v61 }
 0x215   :  { %v531_v58 = vmul.f32 %v525_v56, %v225_v55  ;;  %v530_v63 = vadd.f32 0.5, %v529_v62 }
 0x217   :  { %v533_v60 = vadd.f32 %v532_v59, %v531_v58 }
 0x219   :  { %1134 = vtanh.f32 %v533_v60  ;;  %537 = vst [vmem:[#allocation17] sm:$0xff] %v533_v60 }
 0x226   :  { %v1135_v1 = vpop.eup %1134 }
 0x227   :  { %v535_v2 = vmul.f32 %v1135_v1, %v530_v63 }
 0x229   :  { %759 = vmatmul.mubr.f32.vlgmr.msra.gmra.mxu1 %v535_v2  ;;  %536 = vst [vmem:[#allocation15] sm:$0xff] %v535_v2  ;;  %830 = vmatmul.mubr.f32.vlgmr.msra.gmra.mxu0 %v535_v2 }
 0x22a   :  { %1105 = vmatprep.mubr.msk.f32.mxu1 %vm1374_vm0, %v1373_v0  ;;  %1074 = vmatpush3.msra.mxu1 %v873_v3 }
 0x22b   :  { %1075 = vmatprep.subr.mxu1 %v1373_v0 }
 0x22c   :  { %1076 = vmatpush3.msra.mxu1 %v872_v4 }
 0x22d   :  { %1077 = vmatprep.subr.mxu1 %v1373_v0 }
 0x22e   :  { %1078 = vmatpush3.msra.mxu1 %v871_v5 }
 0x22f   :  { %1079 = vmatprep.subr.mxu1 %v1373_v0 }
 0x230   :  { %1080 = vmatpush3.msra.mxu1 %v870_v6 }
 0x231   :  { %1081 = vmatprep.subr.mxu1 %v1373_v0 }
 0x232   :  { %1082 = vmatpush3.msra.mxu1 %v869_v7 }
 0x233   :  { %1083 = vmatprep.subr.mxu1 %v1373_v0 }
 0x234   :  { %1084 = vmatpush3.msra.mxu1 %v868_v8 }
 0x235   :  { %1085 = vmatprep.subr.mxu1 %v1373_v0 }
 0x236   :  { %1086 = vmatpush3.msra.mxu1 %v867_v9 }
 0x237   :  { %1087 = vmatprep.subr.mxu1 %v1373_v0 }
 0x238   :  { %1088 = vmatpush3.msra.mxu1 %v866_v10 }
 0x239   :  { %1089 = vmatprep.subr.mxu1 %v1373_v0 }
 0x23a   :  { %1090 = vmatpush3.msra.mxu1 %v865_v11 }
 0x23b   :  { %1091 = vmatprep.subr.mxu1 %v1373_v0 }
 0x23c   :  { %1092 = vmatpush3.msra.mxu1 %v864_v12 }
 0x23d   :  { %1093 = vmatprep.subr.mxu1 %v1373_v0 }
 0x23e   :  { %1094 = vmatpush3.msra.mxu1 %v863_v13 }
 0x23f   :  { %1095 = vmatprep.subr.mxu1 %v1373_v0 }
 0x240   :  { %1096 = vmatpush3.msra.mxu1 %v862_v14 }
 0x241   :  { %1097 = vmatprep.subr.mxu1 %v1373_v0 }
 0x242   :  { %1098 = vmatpush3.msra.mxu1 %v861_v15 }
 0x243   :  { %1099 = vmatprep.subr.mxu1 %v1373_v0 }
 0x244   :  { %1100 = vmatpush3.msra.mxu1 %v860_v16 }
 0x245   :  { %1101 = vmatprep.subr.mxu1 %v1373_v0 }
 0x246   :  { %1102 = vmatpush3.msra.mxu1 %v859_v17 }
 0x247   :  { %1103 = vmatprep.subr.mxu1 %v1373_v0 }
 0x248   :  { %1104 = vmatpush3.msra.mxu1 %v858_v18 }
 0x2e9   :  { %v760_v22 = vpop.f32.mrf.mxu1  ;;  %v831_v28 = vpop.f32.mrf.mxu0 }
 0x2ea   :  { %v761_v23 = vadd.f32 %v760_v22, %v677_v20  ;;  %v832_v0 = vadd.f32 %v831_v28, %v685_v26 }
 0x2eb   :  { %v762_v24 = vpop.f32.mrf.mxu1  ;;  %v833_v30 = vpop.f32.mrf.mxu0 }
 0x2ec   :  { %v836_v25 = vmul.f32 0.5, %v761_v23  ;;  %v763_v27 = vadd.f32 %v762_v24, %v681_v21  ;;  %v834_v35 = vadd.f32 %v833_v30, %v689_v33 }
 0x2ee   :  { %1136 = vtanh.f32 %v836_v25  ;;  %v840_v31 = vmul.f32 0.5, %v763_v27  ;;  %v845_v32 = vmul.f32 0.5, %v834_v35 }
 0x2f0   :  { %1138 = vtanh.f32 %v840_v31 }
 0x2f1   :  { %1140 = vtanh.f32 %v832_v0 }
 0x2f2   :  { %1142 = vtanh.f32 %v845_v32 }
 0x2fb   :  { %v1137_v36 = vpop.eup %1136 }
 0x2fc   :  { %v838_v37 = vmul.f32 0.5, %v1137_v36 }
 0x2fd   :  { %v1139_v38 = vpop.eup %1138 }
 0x2fe   :  { %v839_v39 = vadd.f32 0.5, %v838_v37  ;;  %v842_v40 = vmul.f32 0.5, %v1139_v38  ;;  %v1141_v42 = vpop.eup %1140 }
 0x2ff   :  { %v1143_v29 = vpop.eup %1142 }
 0x300   :  { %v843_v41 = vadd.f32 0.5, %v842_v40  ;;  %v850_v45 = vmul.f32 %v1141_v42, %v839_v39  ;;  %v847_v44 = vmul.f32 0.5, %v1143_v29 }
 0x302   :  { %v849_v43 = vmul.f32 %v843_v41, %v541_v34  ;;  %v848_v47 = vadd.f32 0.5, %v847_v44 }
 0x304   :  { %v851_v46 = vadd.f32 %v850_v45, %v849_v43 }
 0x306   :  { %1144 = vtanh.f32 %v851_v46  ;;  %857 = vst [vmem:[#allocation17 + $0x8] sm:$0xff] %v851_v46 }
 0x313   :  { %v1145_v48 = vpop.eup %1144 }
 0x314   :  { %v853_v49 = vmul.f32 %v1145_v48, %v848_v47 }
 0x316   :  { %1106 = vmatmul.mubr.f32.vlgmr.msra.gmra.mxu1 %v853_v49  ;;  %855 = vst [vmem:[#allocation15 + $0x8] sm:$0xff] %v853_v49 }
 0x317   :  { %1299 = shalt.err (!%p1296_p11)
}
 0x318   :  { %974 = dma.vmem_to_hbm [thread:$0]  %s969_s16, 256, %s1560_s10, [#allocation16], %s1361_s20, %s1361_s20, %s1362_s21  }
 0x319   :  { %s1376_s19 = smov [#allocation17]  }
 0x31a   :  { %s980_s22 = sshll.u32 %s1376_s19, 4  ;;  %s981_s22 = int_to_ptr.vmem [resolvable:$true] %s980_s22 }
 0x31b   :  { %s1308_s23 = scalar_lea.vmem %s981_s22, 256  ;;  %p1313_p13 = scmp.lt.s32.totalorder %s981_s22, %s981_s22 }
 0x31c   :  { %p1309_p12 = scmp.ne.s32.totalorder %s981_s22, %s1308_s23  ;;  %p1314_p0 = scmp.lt.s32.totalorder %s1308_s23, %s1308_s23 }
 0x31e   :  { %p1315_p1 = por %p1314_p0, %p1313_p13 }
 0x320   :  { %p1316_p2 = pnand %p1315_p1, %p1309_p12 }
 0x322   :  { %1319 = shalt.err (!%p1316_p2)
}
 0x323   :  { %986 = dma.vmem_to_hbm [thread:$0]  %s981_s22, 256, %s1561_s11, [#allocation16], %s1361_s20, %s1361_s20, %s1362_s21  }
 0x324   :  { %v1003_v50 = vld [vmem:[%s1558_s8] ss:$0 sm:$0xff]  ;;  %s1377_s10 = smov [#allocation14]  }
 0x325   :  { %s959_s27 = sshll.u32 %s1377_s10, 4  ;;  %s960_s27 = int_to_ptr.vmem [resolvable:$true] %s959_s27 }
 0x326   :  { %s1328_s28 = scalar_lea.vmem %s960_s27, 128  ;;  %p1333_p4 = scmp.lt.s32.totalorder %s960_s27, %s960_s27 }
 0x327   :  { %p1329_p3 = scmp.ne.s32.totalorder %s960_s27, %s1328_s28  ;;  %p1334_p5 = scmp.lt.s32.totalorder %s1328_s28, %s1328_s28 }
 0x329   :  { %p1335_p6 = por %p1334_p5, %p1333_p4 }
 0x32b   :  { %p1336_p7 = pnand %p1335_p6, %p1329_p3 }
 0x3d6   :  { %v947_v51 = vpop.f32.mrf.mxu1 }
 0x3d7   :  { %v948_v52 = vadd.f32 %v1003_v50, %v947_v51 }
 0x3d8   :  { %v1107_v53 = vpop.f32.mrf.mxu1 }
 0x3d9   :  { %1146 = vtanh.f32 %v948_v52 }
 0x3e6   :  { %v1147_v54 = vpop.eup %1146 }
 0x3e7   :  { %952 = vst [vmem:[#allocation14] sm:$0xff] %v1147_v54 }
 0x3e8   :  { %1339 = shalt.err (!%p1336_p7)
}
 0x3e9   :  { %962 = dma.vmem_to_hbm [thread:$0]  %s960_s27, 128, %s1559_s9, [#allocation4]  }
 0x3ea   :  { %1356 = dma.done.wait [#allocation4], 128  }
 0x3eb   :  { %1357 = vsyncadd [#allocation4], 4294967168 }
 0x3ec   :  { %1358 = dma.done.wait [#allocation16], 512  }
 0x3ed   :  { %1359 = vsyncadd [#allocation16], 4294966784 }
 0x3ee   :  { %996 = vsyncpa [#allocation3], 1 }
 0x3ef   :  { %997 = vsyncpa [#allocation6], 1 }
 0x3f0   :  { %998 = vsyncpa [#allocation9], 1 }
 0x3f1   :  { %999 = vsyncpa [#allocation12], 1 }
 0x3f2   :  { %1000 = vsyncpa [#allocation4], 1 }
 0x3f3   :  { %1001 = vsyncpa [#allocation16], 1 }

</bundles_post_ra>
